<compile_context>
chip_gen: v6e
topology: v6e:2x2x1
jax: 0.10.0
libtpu: 0.0.40
codegen_flags: <defaults>
</compile_context>

<pallas_src>
import functools

import jax
import jax.numpy as jnp
from jax import lax
from jax.experimental import pallas as pl
from jax.experimental.pallas import tpu as pltpu

EPS = 1e-5  # nn.GroupNorm default eps


@functools.lru_cache(maxsize=None)
def _roll_shift_sign():
    """Probe pltpu.roll once on device.

    Returns +1 if pltpu.roll matches np.roll semantics (result[i] = x[i-shift]),
    -1 if it rotates the opposite way, 0 if it fails to lower (the kernel then
    falls back to a slice+concat lane shift).
    """
    def probe(x_ref, o_ref):
        o_ref[...] = pltpu.roll(x_ref[...], shift=1, axis=1)

    x = jnp.broadcast_to(jnp.arange(256, dtype=jnp.float32), (8, 256))
    try:
        y = pl.pallas_call(
            probe, out_shape=jax.ShapeDtypeStruct((8, 256), jnp.float32))(x)
        first = float(jax.block_until_ready(y)[0, 0])
    except Exception:
        return 0
    if first == 255.0:
        return 1
    if first == 1.0:
        return -1
    return 0


def _c2f_kernel(x_ref, wc1_ref, gc1_ref, bc1_ref,
                wb1_ref, gb1_ref, bb1_ref,
                wb2_ref, gb2_ref, bb2_ref,
                wc2_ref, gc2_ref, bc2_ref,
                o_ref, *, n, c, H, W, shortcut, cdt, roll_sign):
    HW = H * W
    f32 = jnp.float32

    # ---- per-position validity masks for the 9 taps of a padded 3x3 conv ----
    pos = lax.broadcasted_iota(jnp.int32, (1, HW), 1)            # hw = h*W + w
    if (W & (W - 1)) == 0:
        col = jnp.bitwise_and(pos, W - 1)                         # w index
    else:
        col = pos % W
    row_ok = {-1: pos >= W, 0: None, 1: pos < (H - 1) * W}
    col_ok = {-1: col >= 1, 0: None, 1: col <= W - 2}

    def tap_mask(dy, dx):
        m = None
        for q in (row_ok[dy], col_ok[dx]):
            if q is not None:
                m = q if m is None else jnp.logical_and(m, q)
        return m

    taps = []                                   # (lane offset, validity mask)
    for kh in range(3):
        for kw in range(3):
            dy, dx = kh - 1, kw - 1
            taps.append((dy * W + dx, tap_mask(dy, dx)))

    def shift_lanes(y, off):
        # result[:, hw] = y[:, (hw + off) % HW]; wrapped positions get masked.
        k = off % HW
        if k == 0:
            return y
        if roll_sign != 0:
            return pltpu.roll(y, shift=(roll_sign * -off) % HW, axis=1)
        return jnp.concatenate([y[:, k:], y[:, :k]], axis=1)     # fallback

    def conv3x3(y, w9):
        # y: (c, HW) f32; w9: (9, c_out, c_in) in compute dtype, t = kh*3 + kw.
        # Shifts/masks in f32 (cheap, avoids packed-dtype rotate edge cases),
        # cast per tap feeds the MXU in bf16.
        acc = None
        for t, (off, mask) in enumerate(taps):
            v = shift_lanes(y, off)
            if mask is not None:
                v = jnp.where(mask, v, 0.0)
            p = jnp.dot(w9[t], v.astype(cdt), preferred_element_type=f32)
            acc = p if acc is None else acc + p
        return acc

    def gn_silu(y, gamma, beta):
        # GroupNorm(C//8, C) + SiLU on an f32 (C, HW) slab, two-pass stats.
        C = y.shape[0]
        yg = y.reshape(C // 8, 8, HW)
        inv_n = 1.0 / (8 * HW)
        mean = yg.sum(axis=2, keepdims=True).sum(axis=1, keepdims=True) * inv_n
        d = yg - mean
        var = (d * d).sum(axis=2, keepdims=True).sum(axis=1, keepdims=True) * inv_n
        z = (d * lax.rsqrt(var + EPS)).reshape(C, HW) * gamma + beta
        return z * jax.nn.sigmoid(z)

    x = x_ref[0]                                                 # (c1, HW) cdt

    # --- cv1: 1x1 conv (channel matmul) -> GN -> SiLU, then chunk(2) ---
    h1 = jnp.dot(wc1_ref[...], x, preferred_element_type=f32)
    h1 = gn_silu(h1, gc1_ref[...], bc1_ref[...])                 # (2c, HW) f32
    y0 = h1[0:c, :]
    y1 = h1[c:2 * c, :]

    # --- cv2 accumulated branch-by-branch (no concat, no ys list) ---
    acc = jnp.dot(wc2_ref[0], y0.astype(cdt), preferred_element_type=f32)
    acc = acc + jnp.dot(wc2_ref[1], y1.astype(cdt), preferred_element_type=f32)

    def bottleneck(i, carry):
        prev, acc = carry
        t = gn_silu(conv3x3(prev, wb1_ref[i]), gb1_ref[i], bb1_ref[i])
        out = gn_silu(conv3x3(t, wb2_ref[i]), gb2_ref[i], bb2_ref[i])
        if shortcut:
            out = prev + out
        acc = acc + jnp.dot(wc2_ref[2 + i], out.astype(cdt),
                            preferred_element_type=f32)
        return out, acc

    _, acc = lax.fori_loop(0, n, bottleneck, (y1, acc))

    # --- cv2 epilogue: GN -> SiLU ---
    o_ref[0] = gn_silu(acc, gc2_ref[...], bc2_ref[...]).astype(o_ref.dtype)


def c2f_pallas(x, params, *, n=1, shortcut=False, compute_dtype=jnp.bfloat16):
    """x: (N, c1, H, W). params: torch-layout conv weights + GroupNorm affine."""
    N, c1, H, W = x.shape
    HW = H * W
    f32 = jnp.float32
    cdt = compute_dtype

    wc1 = jnp.asarray(params["wc1"])            # (2c, c1, 1, 1)
    two_c = wc1.shape[0]
    c = two_c // 2
    wc2 = jnp.asarray(params["wc2"])            # (c2, (2+n)*c, 1, 1)
    c2 = wc2.shape[0]

    assert two_c % 8 == 0 and c % 8 == 0 and c2 % 8 == 0, "GroupNorm(C//8) needs C%8==0"
    assert HW % 128 == 0, "H*W must be a multiple of 128 for the lane-dense layout"
    assert wc2.shape[1] == (2 + n) * c

    # ----- layout glue (cheap host-side reshapes/transposes, done once) -----
    x2 = x.reshape(N, c1, HW).astype(cdt)                        # lane-dense slabs
    wc1_2d = wc1.reshape(two_c, c1).astype(cdt)
    # cv2 split per input branch: (2+n, c2, c) so the kernel indexes branch k
    # on the leading dim (no dynamic lane slicing).
    wc2_parts = wc2.reshape(c2, 2 + n, c).transpose(1, 0, 2).astype(cdt)

    def prep_3x3(ws):
        # list of (c, c, 3, 3) -> (n, 9, c_out, c_in), tap index t = kh*3 + kw
        stk = jnp.stack([jnp.asarray(w) for w in ws], axis=0)
        return stk.transpose(0, 3, 4, 1, 2).reshape(n, 9, c, c).astype(cdt)

    def col_vec(p):
        return jnp.asarray(p).reshape(-1, 1).astype(f32)

    def col_stack(ps):
        return jnp.stack([jnp.asarray(p).reshape(-1, 1) for p in ps],
                         axis=0).astype(f32)

    wb1, wb2 = prep_3x3(params["wb1"]), prep_3x3(params["wb2"])
    gc1, bc1 = col_vec(params["gc1"]), col_vec(params["bc1"])
    gb1, bb1 = col_stack(params["gb1"]), col_stack(params["bb1"])
    gb2, bb2 = col_stack(params["gb2"]), col_stack(params["bb2"])
    gc2, bc2 = col_vec(params["gc2"]), col_vec(params["bc2"])

    roll_sign = _roll_shift_sign()

    kernel = functools.partial(_c2f_kernel, n=n, c=c, H=H, W=W,
                               shortcut=shortcut, cdt=cdt, roll_sign=roll_sign)

    def full(shape):
        rank = len(shape)
        return pl.BlockSpec(shape, lambda b, _r=rank: (0,) * _r)

    # advisory cost estimate
    flops = N * (2 * two_c * c1 * HW
                 + n * 2 * (2 * c * 9 * c * HW)
                 + 2 * c2 * (2 + n) * c * HW)
    transcendentals = N * (two_c + 2 * n * c + c2) * HW
    itemsize = jnp.dtype(cdt).itemsize
    weight_bytes = (int(wc1_2d.size + wb1.size + wb2.size + wc2_parts.size) * itemsize
                    + int(gc1.size + bc1.size + gb1.size + bb1.size
                          + gb2.size + bb2.size + gc2.size + bc2.size) * 4)
    bytes_accessed = int(x2.size) * itemsize + N * c2 * HW * 4 + weight_bytes

    # size the scoped-VMEM limit to the real working set (defaults 16/32 MiB)
    block_bytes = c1 * HW * itemsize + c2 * HW * 4
    live_f32 = (2 * c + 2 * c + c2 + 2 * c) * HW * 4  # h1, prev/t, cv2 acc, tap temps
    est = 2 * block_bytes + 2 * weight_bytes + live_f32
    vmem_limit = int(min(64 * 2 ** 20, max(8 * 2 ** 20, 4 * est)))

    out = pl.pallas_call(
        kernel,
        out_shape=jax.ShapeDtypeStruct((N, c2, HW), x.dtype),
        grid_spec=pltpu.PrefetchScalarGridSpec(
            num_scalar_prefetch=0,
            grid=(N,),
            in_specs=[
                pl.BlockSpec((1, c1, HW), lambda b: (b, 0, 0)),
                # constant operands (index_map always 0); could be
                # single-buffered with pipeline_mode=pl.Buffered(1) on v7x.
                full((two_c, c1)), full((two_c, 1)), full((two_c, 1)),
                full((n, 9, c, c)), full((n, c, 1)), full((n, c, 1)),
                full((n, 9, c, c)), full((n, c, 1)), full((n, c, 1)),
                full((2 + n, c2, c)), full((c2, 1)), full((c2, 1)),
            ],
            out_specs=pl.BlockSpec((1, c2, HW), lambda b: (b, 0, 0)),
        ),
        compiler_params=pltpu.CompilerParams(
            dimension_semantics=("parallel",),
            vmem_limit_bytes=vmem_limit),
        cost_estimate=pl.CostEstimate(flops=flops,
                                      transcendentals=transcendentals,
                                      bytes_accessed=bytes_accessed),
    )(x2, wc1_2d, gc1, bc1, wb1, gb1, bb1, wb2, gb2, bb2, wc2_parts, gc2, bc2)

    return out.reshape(N, c2, H, W)


# ----------------------------- pure-JAX reference -----------------------------
def _gn_ref(y, gamma, beta, groups):
    N, C, H, W = y.shape
    yg = y.reshape(N, groups, C // groups, H, W)
    m = yg.mean(axis=(2, 3, 4), keepdims=True)
    v = ((yg - m) ** 2).mean(axis=(2, 3, 4), keepdims=True)
    yn = ((yg - m) / jnp.sqrt(v + EPS)).reshape(N, C, H, W)
    return yn * gamma[None, :, None, None] + beta[None, :, None, None]


def _conv_block_ref(x, w, g, b, pad, cdt):
    w = jnp.asarray(w)
    y = lax.conv_general_dilated(
        x.astype(cdt), w.astype(cdt), (1, 1), [(pad, pad), (pad, pad)],
        dimension_numbers=("NCHW", "OIHW", "NCHW"),
        preferred_element_type=jnp.float32)
    y = _gn_ref(y, jnp.asarray(g), jnp.asarray(b), w.shape[0] // 8)
    return y * jax.nn.sigmoid(y)


def _c2f_ref(x, params, n, shortcut, cdt=jnp.float32):
    h1 = _conv_block_ref(x, params["wc1"], params["gc1"], params["bc1"], 0, cdt)
    c = h1.shape[1] // 2
    ys = [h1[:, :c], h1[:, c:]]
    for i in range(n):
        prev = ys[-1]
        t = _conv_block_ref(prev, params["wb1"][i], params["gb1"][i],
                            params["bb1"][i], 1, cdt)
        out = _conv_block_ref(t, params["wb2"][i], params["gb2"][i],
                              params["bb2"][i], 1, cdt)
        if shortcut:
            out = prev + out
        ys.append(out)
    return _conv_block_ref(jnp.concatenate(ys, axis=1),
                           params["wc2"], params["gc2"], params["bc2"], 0, cdt)


def make_c2f_params(key, c1, c2_out, n, e=0.5):
    c = int(c2_out * e)
    f32 = jnp.float32
    keys = iter(jax.random.split(key, 6 + 6 * n))

    def conv_w(co, ci, kh, kw):
        return 0.1 * jax.random.normal(next(keys), (co, ci, kh, kw), dtype=f32)

    def gamma(ch):
        return 1.0 + 0.05 * jax.random.normal(next(keys), (ch,), dtype=f32)

    def beta(ch):
        return 0.05 * jax.random.normal(next(keys), (ch,), dtype=f32)

    return {
        "wc1": conv_w(2 * c, c1, 1, 1), "gc1": gamma(2 * c), "bc1": beta(2 * c),
        "wb1": [conv_w(c, c, 3, 3) for _ in range(n)],
        "gb1": [gamma(c) for _ in range(n)],
        "bb1": [beta(c) for _ in range(n)],
        "wb2": [conv_w(c, c, 3, 3) for _ in range(n)],
        "gb2": [gamma(c) for _ in range(n)],
        "bb2": [beta(c) for _ in range(n)],
        "wc2": conv_w(c2_out, (2 + n) * c, 1, 1),
        "gc2": gamma(c2_out), "bc2": beta(c2_out),
    }


if __name__ == "__main__":
    root = jax.random.PRNGKey(0)
    kp1, kx1, kp2, kx2 = jax.random.split(root, 4)

    # ---- config A: C2f(16, 16, n=1, shortcut=False), x: (2, 16, 16, 16) ----
    n1, sc1 = 1, False
    p1 = make_c2f_params(kp1, 16, 16, n1)
    x1 = jax.random.normal(kx1, (2, 16, 16, 16), dtype=jnp.float32)

    # full-precision path: algorithmic correctness vs. the pure f32 reference
    out = jax.block_until_ready(
        c2f_pallas(x1, p1, n=n1, shortcut=sc1, compute_dtype=jnp.float32))
    ref = _c2f_ref(x1, p1, n1, sc1, cdt=jnp.float32)
    assert out.shape == (2, 16, 16, 16)
    err = float(jnp.max(jnp.abs(out - ref)))
    assert jnp.allclose(out, ref, rtol=1e-3, atol=1e-3), f"f32 path err={err}"

    # bf16 MXU path (default): compare against a matching-precision reference
    out_bf = jax.block_until_ready(c2f_pallas(x1, p1, n=n1, shortcut=sc1))
    ref_bf = _c2f_ref(x1, p1, n1, sc1, cdt=jnp.bfloat16)
    err = float(jnp.max(jnp.abs(out_bf - ref_bf)))
    assert jnp.allclose(out_bf, ref_bf, rtol=2.5e-2, atol=2.5e-2), f"bf16 err={err}"

    # ---- config B: C2f(16, 16, n=2, shortcut=True), x: (1, 16, 8, 32) ----
    n2, sc2 = 2, True
    p2 = make_c2f_params(kp2, 16, 16, n2)
    x2 = jax.random.normal(kx2, (1, 16, 8, 32), dtype=jnp.float32)
    out2 = jax.block_until_ready(c2f_pallas(x2, p2, n=n2, shortcut=sc2))
    ref2 = _c2f_ref(x2, p2, n2, sc2, cdt=jnp.bfloat16)
    err2 = float(jnp.max(jnp.abs(out2 - ref2)))
    assert jnp.allclose(out2, ref2, rtol=2.5e-2, atol=2.5e-2), f"bf16 n=2 err={err2}"

    print("KERNEL_OK")
</pallas_src>

<mosaic_0001>
module attributes {stable_mosaic.version = 11 : i64} {
  func.func @probe(%arg0: memref<8x256xf32, #tpu.memory_space<vmem>>, %arg1: memref<8x256xf32, #tpu.memory_space<vmem>>) attributes {dimension_semantics = [], scalar_prefetch = 0 : i64, scratch_operands = 0 : i64, tpu.core_type = #tpu.core_type<tc>} {
    %c0 = arith.constant 0 : index
    %c0_0 = arith.constant 0 : index
    %0 = vector.load %arg0[%c0, %c0_0] : memref<8x256xf32, #tpu.memory_space<vmem>>, vector<8x256xf32>
    %c1_i32 = arith.constant 1 : i32
    %1 = tpu.dynamic_rotate %0 by %c1_i32 dim 1 : vector<8x256xf32>, i32 -> vector<8x256xf32>
    %c0_1 = arith.constant 0 : index
    %c0_2 = arith.constant 0 : index
    %2 = vector.load %arg1[%c0_1, %c0_2] : memref<8x256xf32, #tpu.memory_space<vmem>>, vector<8x256xf32>
    tpu.vector_store %arg1[%c0_1, %c0_2], %1 {strides = array<i32>} : memref<8x256xf32, #tpu.memory_space<vmem>>, vector<8x256xf32>,
    return
  }
}

module attributes {stable_mosaic.version = 11 : i64} {
  func.func @_c2f_kernel(%arg0: i32, %arg1: memref<1x16x256xf32, #tpu.memory_space<vmem>>, %arg2: memref<16x16xf32, #tpu.memory_space<vmem>>, %arg3: memref<16x1xf32, #tpu.memory_space<vmem>>, %arg4: memref<16x1xf32, #tpu.memory_space<vmem>>, %arg5: memref<1x9x8x8xf32, #tpu.memory_space<vmem>>, %arg6: memref<1x8x1xf32, #tpu.memory_space<vmem>>, %arg7: memref<1x8x1xf32, #tpu.memory_space<vmem>>, %arg8: memref<1x9x8x8xf32, #tpu.memory_space<vmem>>, %arg9: memref<1x8x1xf32, #tpu.memory_space<vmem>>, %arg10: memref<1x8x1xf32, #tpu.memory_space<vmem>>, %arg11: memref<3x16x8xf32, #tpu.memory_space<vmem>>, %arg12: memref<16x1xf32, #tpu.memory_space<vmem>>, %arg13: memref<16x1xf32, #tpu.memory_space<vmem>>, %arg14: memref<1x16x256xf32, #tpu.memory_space<vmem>>) attributes {dimension_semantics = [#tpu.dimension_semantics<parallel>], iteration_bounds = array<i64: 2>, scalar_prefetch = 0 : i64, scratch_operands = 0 : i64, tpu.core_type = #tpu.core_type<tc>, window_params = [{transform_indices = @transform_0, window_bounds = array<i64: 1, 16, 256>}, {pipeline_mode = #tpu.pipeline_mode<synchronous>, transform_indices = @transform_1, window_bounds = array<i64: 16, 16>}, {pipeline_mode = #tpu.pipeline_mode<synchronous>, transform_indices = @transform_2, window_bounds = array<i64: 16, 1>}, {pipeline_mode = #tpu.pipeline_mode<synchronous>, transform_indices = @transform_3, window_bounds = array<i64: 16, 1>}, {pipeline_mode = #tpu.pipeline_mode<synchronous>, transform_indices = @transform_4, window_bounds = array<i64: 1, 9, 8, 8>}, {pipeline_mode = #tpu.pipeline_mode<synchronous>, transform_indices = @transform_5, window_bounds = array<i64: 1, 8, 1>}, {pipeline_mode = #tpu.pipeline_mode<synchronous>, transform_indices = @transform_6, window_bounds = array<i64: 1, 8, 1>}, {pipeline_mode = #tpu.pipeline_mode<synchronous>, transform_indices = @transform_7, window_bounds = array<i64: 1, 9, 8, 8>}, {pipeline_mode = #tpu.pipeline_mode<synchronous>, transform_indices = @transform_8, window_bounds = array<i64: 1, 8, 1>}, {pipeline_mode = #tpu.pipeline_mode<synchronous>, transform_indices = @transform_9, window_bounds = array<i64: 1, 8, 1>}, {pipeline_mode = #tpu.pipeline_mode<synchronous>, transform_indices = @transform_10, window_bounds = array<i64: 3, 16, 8>}, {pipeline_mode = #tpu.pipeline_mode<synchronous>, transform_indices = @transform_11, window_bounds = array<i64: 16, 1>}, {pipeline_mode = #tpu.pipeline_mode<synchronous>, transform_indices = @transform_12, window_bounds = array<i64: 16, 1>}, {transform_indices = @transform_13, window_bounds = array<i64: 1, 16, 256>}]} {
    %0 = tpu.iota {dimensions = array<i32: 1>} : vector<1x256xi32>
    %c15_i32 = arith.constant 15 : i32
    %1 = vector.broadcast %c15_i32 : i32 to vector<1x256xi32>
    %2 = arith.andi %0, %1 : vector<1x256xi32>
    %c16_i32 = arith.constant 16 : i32
    %3 = vector.broadcast %c16_i32 : i32 to vector<1x256xi32>
    %4 = arith.cmpi sge, %0, %3 : vector<1x256xi32>
    %c240_i32 = arith.constant 240 : i32
    %5 = vector.broadcast %c240_i32 : i32 to vector<1x256xi32>
    %6 = arith.cmpi slt, %0, %5 : vector<1x256xi32>
    %c1_i32 = arith.constant 1 : i32
    %7 = vector.broadcast %c1_i32 : i32 to vector<1x256xi32>
    %8 = arith.cmpi sge, %2, %7 : vector<1x256xi32>
    %c14_i32 = arith.constant 14 : i32
    %9 = vector.broadcast %c14_i32 : i32 to vector<1x256xi32>
    %10 = arith.cmpi sle, %2, %9 : vector<1x256xi32>
    %11 = arith.andi %4, %8 : vector<1x256xi1>
    %12 = arith.andi %4, %10 : vector<1x256xi1>
    %13 = arith.andi %6, %8 : vector<1x256xi1>
    %14 = arith.andi %6, %10 : vector<1x256xi1>
    %c0 = arith.constant 0 : index
    %c0_0 = arith.constant 0 : index
    %c0_1 = arith.constant 0 : index
    %15 = vector.load %arg1[%c0, %c0_0, %c0_1] : memref<1x16x256xf32, #tpu.memory_space<vmem>>, vector<1x16x256xf32>
    %16 = vector.shape_cast %15 : vector<1x16x256xf32> to vector<16x256xf32>
    %c0_2 = arith.constant 0 : index
    %c0_3 = arith.constant 0 : index
    %17 = vector.load %arg2[%c0_2, %c0_3] : memref<16x16xf32, #tpu.memory_space<vmem>>, vector<16x16xf32>
    %cst = arith.constant dense<0.000000e+00> : vector<16x256xf32>
    %18 = tpu.matmul %17, %16, %cst {dimension_numbers = #tpu.dot_dimension_numbers<[1], [0], [0], [1], [0, 0, 1, 1], [], []>} : vector<16x16xf32>, vector<16x256xf32>, vector<16x256xf32> -> vector<16x256xf32>
    %c0_4 = arith.constant 0 : index
    %c0_5 = arith.constant 0 : index
    %19 = vector.load %arg3[%c0_4, %c0_5] : memref<16x1xf32, #tpu.memory_space<vmem>>, vector<16x1xf32>
    %c0_6 = arith.constant 0 : index
    %c0_7 = arith.constant 0 : index
    %20 = vector.load %arg4[%c0_6, %c0_7] : memref<16x1xf32, #tpu.memory_space<vmem>>, vector<16x1xf32>
    %21 = vector.shape_cast %18 : vector<16x256xf32> to vector<2x8x256xf32>
    %cst_8 = arith.constant dense<0.000000e+00> : vector<2x8xf32>
    %22 = vector.multi_reduction <add>, %21, %cst_8 [2] : vector<2x8x256xf32> to vector<2x8xf32>
    %23 = vector.shape_cast %22 : vector<2x8xf32> to vector<2x8x1xf32>
    %cst_9 = arith.constant dense<0.000000e+00> : vector<2x1xf32>
    %24 = vector.multi_reduction <add>, %23, %cst_9 [1] : vector<2x8x1xf32> to vector<2x1xf32>
    %25 = vector.shape_cast %24 : vector<2x1xf32> to vector<2x1x1xf32>
    %cst_10 = arith.constant 4.8828125E-4 : f32
    %26 = vector.broadcast %cst_10 : f32 to vector<2x1x1xf32>
    %27 = arith.mulf %25, %26 : vector<2x1x1xf32>
    %28 = vector.broadcast %27 : vector<2x1x1xf32> to vector<2x8x256xf32>
    %29 = arith.subf %21, %28 : vector<2x8x256xf32>
    %30 = arith.mulf %29, %29 : vector<2x8x256xf32>
    %cst_11 = arith.constant dense<0.000000e+00> : vector<2x8xf32>
    %31 = vector.multi_reduction <add>, %30, %cst_11 [2] : vector<2x8x256xf32> to vector<2x8xf32>
    %32 = vector.shape_cast %31 : vector<2x8xf32> to vector<2x8x1xf32>
    %cst_12 = arith.constant dense<0.000000e+00> : vector<2x1xf32>
    %33 = vector.multi_reduction <add>, %32, %cst_12 [1] : vector<2x8x1xf32> to vector<2x1xf32>
    %34 = vector.shape_cast %33 : vector<2x1xf32> to vector<2x1x1xf32>
    %cst_13 = arith.constant 4.8828125E-4 : f32
    %35 = vector.broadcast %cst_13 : f32 to vector<2x1x1xf32>
    %36 = arith.mulf %34, %35 : vector<2x1x1xf32>
    %cst_14 = arith.constant 9.99999974E-6 : f32
    %37 = vector.broadcast %cst_14 : f32 to vector<2x1x1xf32>
    %38 = arith.addf %36, %37 : vector<2x1x1xf32>
    %39 = math.rsqrt %38 : vector<2x1x1xf32>
    %40 = vector.broadcast %39 : vector<2x1x1xf32> to vector<2x8x256xf32>
    %41 = arith.mulf %29, %40 : vector<2x8x256xf32>
    %42 = vector.shape_cast %41 : vector<2x8x256xf32> to vector<16x256xf32>
    %43 = vector.broadcast %19 : vector<16x1xf32> to vector<16x256xf32>
    %44 = arith.mulf %42, %43 : vector<16x256xf32>
    %45 = vector.broadcast %20 : vector<16x1xf32> to vector<16x256xf32>
    %46 = arith.addf %44, %45 : vector<16x256xf32>
    %47 = arith.negf %46 : vector<16x256xf32>
    %48 = math.exp %47 : vector<16x256xf32>
    %cst_15 = arith.constant 1.000000e+00 : f32
    %49 = vector.broadcast %cst_15 : f32 to vector<16x256xf32>
    %50 = arith.addf %49, %48 : vector<16x256xf32>
    %51 = arith.divf %49, %50 : vector<16x256xf32>
    %52 = arith.mulf %46, %51 : vector<16x256xf32>
    %53 = vector.extract_strided_slice %52 {offsets = [0, 0], sizes = [8, 256], strides = [1, 1]} : vector<16x256xf32> to vector<8x256xf32>
    %54 = vector.extract_strided_slice %52 {offsets = [8, 0], sizes = [8, 256], strides = [1, 1]} : vector<16x256xf32> to vector<8x256xf32>
    %c0_16 = arith.constant 0 : index
    %c0_17 = arith.constant 0 : index
    %c0_18 = arith.constant 0 : index
    %55 = vector.load %arg11[%c0_16, %c0_17, %c0_18] : memref<3x16x8xf32, #tpu.memory_space<vmem>>, vector<1x16x8xf32>
    %56 = vector.shape_cast %55 : vector<1x16x8xf32> to vector<16x8xf32>
    %cst_19 = arith.constant dense<0.000000e+00> : vector<16x256xf32>
    %57 = tpu.matmul %56, %53, %cst_19 {dimension_numbers = #tpu.dot_dimension_numbers<[1], [0], [0], [1], [0, 0, 1, 1], [], []>} : vector<16x8xf32>, vector<8x256xf32>, vector<16x256xf32> -> vector<16x256xf32>
    %c1 = arith.constant 1 : index
    %c0_20 = arith.constant 0 : index
    %c0_21 = arith.constant 0 : index
    %58 = vector.load %arg11[%c1, %c0_20, %c0_21] : memref<3x16x8xf32, #tpu.memory_space<vmem>>, vector<1x16x8xf32>
    %59 = vector.shape_cast %58 : vector<1x16x8xf32> to vector<16x8xf32>
    %cst_22 = arith.constant dense<0.000000e+00> : vector<16x256xf32>
    %60 = tpu.matmul %59, %54, %cst_22 {dimension_numbers = #tpu.dot_dimension_numbers<[1], [0], [0], [1], [0, 0, 1, 1], [], []>} : vector<16x8xf32>, vector<8x256xf32>, vector<16x256xf32> -> vector<16x256xf32>
    %61 = arith.addf %57, %60 : vector<16x256xf32>
    %c0_i32 = arith.constant 0 : i32
    %62 = arith.index_cast %c0_i32 : i32 to index
    %c0_23 = arith.constant 0 : index
    %c0_24 = arith.constant 0 : index
    %c0_25 = arith.constant 0 : index
    %63 = vector.load %arg5[%62, %c0_23, %c0_24, %c0_25] : memref<1x9x8x8xf32, #tpu.memory_space<vmem>>, vector<1x9x8x8xf32>
    %64 = vector.shape_cast %63 : vector<1x9x8x8xf32> to vector<9x8x8xf32>
    %65 = vector.extract_strided_slice %54 {offsets = [0, 239], sizes = [8, 17], strides = [1, 1]} : vector<8x256xf32> to vector<8x17xf32>
    %66 = vector.extract_strided_slice %54 {offsets = [0, 0], sizes = [8, 239], strides = [1, 1]} : vector<8x256xf32> to vector<8x239xf32>
    %67 = tpu.concatenate %65, %66 in 1 : vector<8x17xf32>, vector<8x239xf32> -> vector<8x256xf32>
    %cst_26 = arith.constant 0.000000e+00 : f32
    %68 = vector.shape_cast %11 : vector<1x256xi1> to vector<1x256xi1>
    %69 = vector.broadcast %68 : vector<1x256xi1> to vector<8x256xi1>
    %70 = vector.broadcast %cst_26 : f32 to vector<8x256xf32>
    %71 = arith.select %69, %67, %70 : vector<8x256xi1>, vector<8x256xf32>
    %72 = vector.extract_strided_slice %64 {offsets = [0, 0, 0], sizes = [1, 8, 8], strides = [1, 1, 1]} : vector<9x8x8xf32> to vector<1x8x8xf32>
    %73 = vector.shape_cast %72 : vector<1x8x8xf32> to vector<8x8xf32>
    %cst_27 = arith.constant dense<0.000000e+00> : vector<8x256xf32>
    %74 = tpu.matmul %73, %71, %cst_27 {dimension_numbers = #tpu.dot_dimension_numbers<[1], [0], [0], [1], [0, 0, 1, 1], [], []>} : vector<8x8xf32>, vector<8x256xf32>, vector<8x256xf32> -> vector<8x256xf32>
    %75 = vector.extract_strided_slice %54 {offsets = [0, 240], sizes = [8, 16], strides = [1, 1]} : vector<8x256xf32> to vector<8x16xf32>
    %76 = vector.extract_strided_slice %54 {offsets = [0, 0], sizes = [8, 240], strides = [1, 1]} : vector<8x256xf32> to vector<8x240xf32>
    %77 = tpu.concatenate %75, %76 in 1 : vector<8x16xf32>, vector<8x240xf32> -> vector<8x256xf32>
    %cst_28 = arith.constant 0.000000e+00 : f32
    %78 = vector.shape_cast %4 : vector<1x256xi1> to vector<1x256xi1>
    %79 = vector.broadcast %78 : vector<1x256xi1> to vector<8x256xi1>
    %80 = vector.broadcast %cst_28 : f32 to vector<8x256xf32>
    %81 = arith.select %79, %77, %80 : vector<8x256xi1>, vector<8x256xf32>
    %82 = vector.extract_strided_slice %64 {offsets = [1, 0, 0], sizes = [1, 8, 8], strides = [1, 1, 1]} : vector<9x8x8xf32> to vector<1x8x8xf32>
    %83 = vector.shape_cast %82 : vector<1x8x8xf32> to vector<8x8xf32>
    %cst_29 = arith.constant dense<0.000000e+00> : vector<8x256xf32>
    %84 = tpu.matmul %83, %81, %cst_29 {dimension_numbers = #tpu.dot_dimension_numbers<[1], [0], [0], [1], [0, 0, 1, 1], [], []>} : vector<8x8xf32>, vector<8x256xf32>, vector<8x256xf32> -> vector<8x256xf32>
    %85 = arith.addf %74, %84 : vector<8x256xf32>
    %86 = vector.extract_strided_slice %54 {offsets = [0, 241], sizes = [8, 15], strides = [1, 1]} : vector<8x256xf32> to vector<8x15xf32>
    %87 = vector.extract_strided_slice %54 {offsets = [0, 0], sizes = [8, 241], strides = [1, 1]} : vector<8x256xf32> to vector<8x241xf32>
    %88 = tpu.concatenate %86, %87 in 1 : vector<8x15xf32>, vector<8x241xf32> -> vector<8x256xf32>
    %cst_30 = arith.constant 0.000000e+00 : f32
    %89 = vector.shape_cast %12 : vector<1x256xi1> to vector<1x256xi1>
    %90 = vector.broadcast %89 : vector<1x256xi1> to vector<8x256xi1>
    %91 = vector.broadcast %cst_30 : f32 to vector<8x256xf32>
    %92 = arith.select %90, %88, %91 : vector<8x256xi1>, vector<8x256xf32>
    %93 = vector.extract_strided_slice %64 {offsets = [2, 0, 0], sizes = [1, 8, 8], strides = [1, 1, 1]} : vector<9x8x8xf32> to vector<1x8x8xf32>
    %94 = vector.shape_cast %93 : vector<1x8x8xf32> to vector<8x8xf32>
    %cst_31 = arith.constant dense<0.000000e+00> : vector<8x256xf32>
    %95 = tpu.matmul %94, %92, %cst_31 {dimension_numbers = #tpu.dot_dimension_numbers<[1], [0], [0], [1], [0, 0, 1, 1], [], []>} : vector<8x8xf32>, vector<8x256xf32>, vector<8x256xf32> -> vector<8x256xf32>
    %96 = arith.addf %85, %95 : vector<8x256xf32>
    %97 = vector.extract_strided_slice %54 {offsets = [0, 255], sizes = [8, 1], strides = [1, 1]} : vector<8x256xf32> to vector<8x1xf32>
    %98 = vector.extract_strided_slice %54 {offsets = [0, 0], sizes = [8, 255], strides = [1, 1]} : vector<8x256xf32> to vector<8x255xf32>
    %99 = tpu.concatenate %97, %98 in 1 : vector<8x1xf32>, vector<8x255xf32> -> vector<8x256xf32>
    %cst_32 = arith.constant 0.000000e+00 : f32
    %100 = vector.shape_cast %8 : vector<1x256xi1> to vector<1x256xi1>
    %101 = vector.broadcast %100 : vector<1x256xi1> to vector<8x256xi1>
    %102 = vector.broadcast %cst_32 : f32 to vector<8x256xf32>
    %103 = arith.select %101, %99, %102 : vector<8x256xi1>, vector<8x256xf32>
    %104 = vector.extract_strided_slice %64 {offsets = [3, 0, 0], sizes = [1, 8, 8], strides = [1, 1, 1]} : vector<9x8x8xf32> to vector<1x8x8xf32>
    %105 = vector.shape_cast %104 : vector<1x8x8xf32> to vector<8x8xf32>
    %cst_33 = arith.constant dense<0.000000e+00> : vector<8x256xf32>
    %106 = tpu.matmul %105, %103, %cst_33 {dimension_numbers = #tpu.dot_dimension_numbers<[1], [0], [0], [1], [0, 0, 1, 1], [], []>} : vector<8x8xf32>, vector<8x256xf32>, vector<8x256xf32> -> vector<8x256xf32>
    %107 = arith.addf %96, %106 : vector<8x256xf32>
    %108 = vector.extract_strided_slice %64 {offsets = [4, 0, 0], sizes = [1, 8, 8], strides = [1, 1, 1]} : vector<9x8x8xf32> to vector<1x8x8xf32>
    %109 = vector.shape_cast %108 : vector<1x8x8xf32> to vector<8x8xf32>
    %cst_34 = arith.constant dense<0.000000e+00> : vector<8x256xf32>
    %110 = tpu.matmul %109, %54, %cst_34 {dimension_numbers = #tpu.dot_dimension_numbers<[1], [0], [0], [1], [0, 0, 1, 1], [], []>} : vector<8x8xf32>, vector<8x256xf32>, vector<8x256xf32> -> vector<8x256xf32>
    %111 = arith.addf %107, %110 : vector<8x256xf32>
    %112 = vector.extract_strided_slice %54 {offsets = [0, 1], sizes = [8, 255], strides = [1, 1]} : vector<8x256xf32> to vector<8x255xf32>
    %113 = vector.extract_strided_slice %54 {offsets = [0, 0], sizes = [8, 1], strides = [1, 1]} : vector<8x256xf32> to vector<8x1xf32>
    %114 = tpu.concatenate %112, %113 in 1 : vector<8x255xf32>, vector<8x1xf32> -> vector<8x256xf32>
    %cst_35 = arith.constant 0.000000e+00 : f32
    %115 = vector.shape_cast %10 : vector<1x256xi1> to vector<1x256xi1>
    %116 = vector.broadcast %115 : vector<1x256xi1> to vector<8x256xi1>
    %117 = vector.broadcast %cst_35 : f32 to vector<8x256xf32>
    %118 = arith.select %116, %114, %117 : vector<8x256xi1>, vector<8x256xf32>
    %119 = vector.extract_strided_slice %64 {offsets = [5, 0, 0], sizes = [1, 8, 8], strides = [1, 1, 1]} : vector<9x8x8xf32> to vector<1x8x8xf32>
    %120 = vector.shape_cast %119 : vector<1x8x8xf32> to vector<8x8xf32>
    %cst_36 = arith.constant dense<0.000000e+00> : vector<8x256xf32>
    %121 = tpu.matmul %120, %118, %cst_36 {dimension_numbers = #tpu.dot_dimension_numbers<[1], [0], [0], [1], [0, 0, 1, 1], [], []>} : vector<8x8xf32>, vector<8x256xf32>, vector<8x256xf32> -> vector<8x256xf32>
    %122 = arith.addf %111, %121 : vector<8x256xf32>
    %123 = vector.extract_strided_slice %54 {offsets = [0, 15], sizes = [8, 241], strides = [1, 1]} : vector<8x256xf32> to vector<8x241xf32>
    %124 = vector.extract_strided_slice %54 {offsets = [0, 0], sizes = [8, 15], strides = [1, 1]} : vector<8x256xf32> to vector<8x15xf32>
    %125 = tpu.concatenate %123, %124 in 1 : vector<8x241xf32>, vector<8x15xf32> -> vector<8x256xf32>
    %cst_37 = arith.constant 0.000000e+00 : f32
    %126 = vector.shape_cast %13 : vector<1x256xi1> to vector<1x256xi1>
    %127 = vector.broadcast %126 : vector<1x256xi1> to vector<8x256xi1>
    %128 = vector.broadcast %cst_37 : f32 to vector<8x256xf32>
    %129 = arith.select %127, %125, %128 : vector<8x256xi1>, vector<8x256xf32>
    %130 = vector.extract_strided_slice %64 {offsets = [6, 0, 0], sizes = [1, 8, 8], strides = [1, 1, 1]} : vector<9x8x8xf32> to vector<1x8x8xf32>
    %131 = vector.shape_cast %130 : vector<1x8x8xf32> to vector<8x8xf32>
    %cst_38 = arith.constant dense<0.000000e+00> : vector<8x256xf32>
    %132 = tpu.matmul %131, %129, %cst_38 {dimension_numbers = #tpu.dot_dimension_numbers<[1], [0], [0], [1], [0, 0, 1, 1], [], []>} : vector<8x8xf32>, vector<8x256xf32>, vector<8x256xf32> -> vector<8x256xf32>
    %133 = arith.addf %122, %132 : vector<8x256xf32>
    %134 = vector.extract_strided_slice %54 {offsets = [0, 16], sizes = [8, 240], strides = [1, 1]} : vector<8x256xf32> to vector<8x240xf32>
    %135 = vector.extract_strided_slice %54 {offsets = [0, 0], sizes = [8, 16], strides = [1, 1]} : vector<8x256xf32> to vector<8x16xf32>
    %136 = tpu.concatenate %134, %135 in 1 : vector<8x240xf32>, vector<8x16xf32> -> vector<8x256xf32>
    %cst_39 = arith.constant 0.000000e+00 : f32
    %137 = vector.shape_cast %6 : vector<1x256xi1> to vector<1x256xi1>
    %138 = vector.broadcast %137 : vector<1x256xi1> to vector<8x256xi1>
    %139 = vector.broadcast %cst_39 : f32 to vector<8x256xf32>
    %140 = arith.select %138, %136, %139 : vector<8x256xi1>, vector<8x256xf32>
    %141 = vector.extract_strided_slice %64 {offsets = [7, 0, 0], sizes = [1, 8, 8], strides = [1, 1, 1]} : vector<9x8x8xf32> to vector<1x8x8xf32>
    %142 = vector.shape_cast %141 : vector<1x8x8xf32> to vector<8x8xf32>
    %cst_40 = arith.constant dense<0.000000e+00> : vector<8x256xf32>
    %143 = tpu.matmul %142, %140, %cst_40 {dimension_numbers = #tpu.dot_dimension_numbers<[1], [0], [0], [1], [0, 0, 1, 1], [], []>} : vector<8x8xf32>, vector<8x256xf32>, vector<8x256xf32> -> vector<8x256xf32>
    %144 = arith.addf %133, %143 : vector<8x256xf32>
    %145 = vector.extract_strided_slice %54 {offsets = [0, 17], sizes = [8, 239], strides = [1, 1]} : vector<8x256xf32> to vector<8x239xf32>
    %146 = vector.extract_strided_slice %54 {offsets = [0, 0], sizes = [8, 17], strides = [1, 1]} : vector<8x256xf32> to vector<8x17xf32>
    %147 = tpu.concatenate %145, %146 in 1 : vector<8x239xf32>, vector<8x17xf32> -> vector<8x256xf32>
    %cst_41 = arith.constant 0.000000e+00 : f32
    %148 = vector.shape_cast %14 : vector<1x256xi1> to vector<1x256xi1>
    %149 = vector.broadcast %148 : vector<1x256xi1> to vector<8x256xi1>
    %150 = vector.broadcast %cst_41 : f32 to vector<8x256xf32>
    %151 = arith.select %149, %147, %150 : vector<8x256xi1>, vector<8x256xf32>
    %152 = vector.extract_strided_slice %64 {offsets = [8, 0, 0], sizes = [1, 8, 8], strides = [1, 1, 1]} : vector<9x8x8xf32> to vector<1x8x8xf32>
    %153 = vector.shape_cast %152 : vector<1x8x8xf32> to vector<8x8xf32>
    %cst_42 = arith.constant dense<0.000000e+00> : vector<8x256xf32>
    %154 = tpu.matmul %153, %151, %cst_42 {dimension_numbers = #tpu.dot_dimension_numbers<[1], [0], [0], [1], [0, 0, 1, 1], [], []>} : vector<8x8xf32>, vector<8x256xf32>, vector<8x256xf32> -> vector<8x256xf32>
    %155 = arith.addf %144, %154 : vector<8x256xf32>
    %156 = arith.index_cast %c0_i32 : i32 to index
    %c0_43 = arith.constant 0 : index
    %c0_44 = arith.constant 0 : index
    %157 = vector.load %arg6[%156, %c0_43, %c0_44] : memref<1x8x1xf32, #tpu.memory_space<vmem>>, vector<1x8x1xf32>
    %158 = vector.shape_cast %157 : vector<1x8x1xf32> to vector<8x1xf32>
    %159 = arith.index_cast %c0_i32 : i32 to index
    %c0_45 = arith.constant 0 : index
    %c0_46 = arith.constant 0 : index
    %160 = vector.load %arg7[%159, %c0_45, %c0_46] : memref<1x8x1xf32, #tpu.memory_space<vmem>>, vector<1x8x1xf32>
    %161 = vector.shape_cast %160 : vector<1x8x1xf32> to vector<8x1xf32>
    %162 = vector.shape_cast %155 : vector<8x256xf32> to vector<1x8x256xf32>
    %cst_47 = arith.constant dense<0.000000e+00> : vector<1x8xf32>
    %163 = vector.multi_reduction <add>, %162, %cst_47 [2] : vector<1x8x256xf32> to vector<1x8xf32>
    %164 = vector.shape_cast %163 : vector<1x8xf32> to vector<1x8x1xf32>
    %cst_48 = arith.constant dense<0.000000e+00> : vector<1x1xf32>
    %165 = vector.multi_reduction <add>, %164, %cst_48 [1] : vector<1x8x1xf32> to vector<1x1xf32>
    %166 = vector.shape_cast %165 : vector<1x1xf32> to vector<1x1x1xf32>
    %cst_49 = arith.constant 4.8828125E-4 : f32
    %167 = vector.broadcast %cst_49 : f32 to vector<1x1x1xf32>
    %168 = arith.mulf %166, %167 : vector<1x1x1xf32>
    %169 = vector.broadcast %168 : vector<1x1x1xf32> to vector<1x8x256xf32>
    %170 = arith.subf %162, %169 : vector<1x8x256xf32>
    %171 = arith.mulf %170, %170 : vector<1x8x256xf32>
    %cst_50 = arith.constant dense<0.000000e+00> : vector<1x8xf32>
    %172 = vector.multi_reduction <add>, %171, %cst_50 [2] : vector<1x8x256xf32> to vector<1x8xf32>
    %173 = vector.shape_cast %172 : vector<1x8xf32> to vector<1x8x1xf32>
    %cst_51 = arith.constant dense<0.000000e+00> : vector<1x1xf32>
    %174 = vector.multi_reduction <add>, %173, %cst_51 [1] : vector<1x8x1xf32> to vector<1x1xf32>
    %175 = vector.shape_cast %174 : vector<1x1xf32> to vector<1x1x1xf32>
    %cst_52 = arith.constant 4.8828125E-4 : f32
    %176 = vector.broadcast %cst_52 : f32 to vector<1x1x1xf32>
    %177 = arith.mulf %175, %176 : vector<1x1x1xf32>
    %cst_53 = arith.constant 9.99999974E-6 : f32
    %178 = vector.broadcast %cst_53 : f32 to vector<1x1x1xf32>
    %179 = arith.addf %177, %178 : vector<1x1x1xf32>
    %180 = math.rsqrt %179 : vector<1x1x1xf32>
    %181 = vector.broadcast %180 : vector<1x1x1xf32> to vector<1x8x256xf32>
    %182 = arith.mulf %170, %181 : vector<1x8x256xf32>
    %183 = vector.shape_cast %182 : vector<1x8x256xf32> to vector<8x256xf32>
    %184 = vector.broadcast %158 : vector<8x1xf32> to vector<8x256xf32>
    %185 = arith.mulf %183, %184 : vector<8x256xf32>
    %186 = vector.broadcast %161 : vector<8x1xf32> to vector<8x256xf32>
    %187 = arith.addf %185, %186 : vector<8x256xf32>
    %188 = arith.negf %187 : vector<8x256xf32>
    %189 = math.exp %188 : vector<8x256xf32>
    %cst_54 = arith.constant 1.000000e+00 : f32
    %190 = vector.broadcast %cst_54 : f32 to vector<8x256xf32>
    %191 = arith.addf %190, %189 : vector<8x256xf32>
    %192 = arith.divf %190, %191 : vector<8x256xf32>
    %193 = arith.mulf %187, %192 : vector<8x256xf32>
    %194 = arith.index_cast %c0_i32 : i32 to index
    %c0_55 = arith.constant 0 : index
    %c0_56 = arith.constant 0 : index
    %c0_57 = arith.constant 0 : index
    %195 = vector.load %arg8[%194, %c0_55, %c0_56, %c0_57] : memref<1x9x8x8xf32, #tpu.memory_space<vmem>>, vector<1x9x8x8xf32>
    %196 = vector.shape_cast %195 : vector<1x9x8x8xf32> to vector<9x8x8xf32>
    %197 = vector.extract_strided_slice %193 {offsets = [0, 239], sizes = [8, 17], strides = [1, 1]} : vector<8x256xf32> to vector<8x17xf32>
    %198 = vector.extract_strided_slice %193 {offsets = [0, 0], sizes = [8, 239], strides = [1, 1]} : vector<8x256xf32> to vector<8x239xf32>
    %199 = tpu.concatenate %197, %198 in 1 : vector<8x17xf32>, vector<8x239xf32> -> vector<8x256xf32>
    %cst_58 = arith.constant 0.000000e+00 : f32
    %200 = vector.shape_cast %11 : vector<1x256xi1> to vector<1x256xi1>
    %201 = vector.broadcast %200 : vector<1x256xi1> to vector<8x256xi1>
    %202 = vector.broadcast %cst_58 : f32 to vector<8x256xf32>
    %203 = arith.select %201, %199, %202 : vector<8x256xi1>, vector<8x256xf32>
    %204 = vector.extract_strided_slice %196 {offsets = [0, 0, 0], sizes = [1, 8, 8], strides = [1, 1, 1]} : vector<9x8x8xf32> to vector<1x8x8xf32>
    %205 = vector.shape_cast %204 : vector<1x8x8xf32> to vector<8x8xf32>
    %cst_59 = arith.constant dense<0.000000e+00> : vector<8x256xf32>
    %206 = tpu.matmul %205, %203, %cst_59 {dimension_numbers = #tpu.dot_dimension_numbers<[1], [0], [0], [1], [0, 0, 1, 1], [], []>} : vector<8x8xf32>, vector<8x256xf32>, vector<8x256xf32> -> vector<8x256xf32>
    %207 = vector.extract_strided_slice %193 {offsets = [0, 240], sizes = [8, 16], strides = [1, 1]} : vector<8x256xf32> to vector<8x16xf32>
    %208 = vector.extract_strided_slice %193 {offsets = [0, 0], sizes = [8, 240], strides = [1, 1]} : vector<8x256xf32> to vector<8x240xf32>
    %209 = tpu.concatenate %207, %208 in 1 : vector<8x16xf32>, vector<8x240xf32> -> vector<8x256xf32>
    %cst_60 = arith.constant 0.000000e+00 : f32
    %210 = vector.shape_cast %4 : vector<1x256xi1> to vector<1x256xi1>
    %211 = vector.broadcast %210 : vector<1x256xi1> to vector<8x256xi1>
    %212 = vector.broadcast %cst_60 : f32 to vector<8x256xf32>
    %213 = arith.select %211, %209, %212 : vector<8x256xi1>, vector<8x256xf32>
    %214 = vector.extract_strided_slice %196 {offsets = [1, 0, 0], sizes = [1, 8, 8], strides = [1, 1, 1]} : vector<9x8x8xf32> to vector<1x8x8xf32>
    %215 = vector.shape_cast %214 : vector<1x8x8xf32> to vector<8x8xf32>
    %cst_61 = arith.constant dense<0.000000e+00> : vector<8x256xf32>
    %216 = tpu.matmul %215, %213, %cst_61 {dimension_numbers = #tpu.dot_dimension_numbers<[1], [0], [0], [1], [0, 0, 1, 1], [], []>} : vector<8x8xf32>, vector<8x256xf32>, vector<8x256xf32> -> vector<8x256xf32>
    %217 = arith.addf %206, %216 : vector<8x256xf32>
    %218 = vector.extract_strided_slice %193 {offsets = [0, 241], sizes = [8, 15], strides = [1, 1]} : vector<8x256xf32> to vector<8x15xf32>
    %219 = vector.extract_strided_slice %193 {offsets = [0, 0], sizes = [8, 241], strides = [1, 1]} : vector<8x256xf32> to vector<8x241xf32>
    %220 = tpu.concatenate %218, %219 in 1 : vector<8x15xf32>, vector<8x241xf32> -> vector<8x256xf32>
    %cst_62 = arith.constant 0.000000e+00 : f32
    %221 = vector.shape_cast %12 : vector<1x256xi1> to vector<1x256xi1>
    %222 = vector.broadcast %221 : vector<1x256xi1> to vector<8x256xi1>
    %223 = vector.broadcast %cst_62 : f32 to vector<8x256xf32>
    %224 = arith.select %222, %220, %223 : vector<8x256xi1>, vector<8x256xf32>
    %225 = vector.extract_strided_slice %196 {offsets = [2, 0, 0], sizes = [1, 8, 8], strides = [1, 1, 1]} : vector<9x8x8xf32> to vector<1x8x8xf32>
    %226 = vector.shape_cast %225 : vector<1x8x8xf32> to vector<8x8xf32>
    %cst_63 = arith.constant dense<0.000000e+00> : vector<8x256xf32>
    %227 = tpu.matmul %226, %224, %cst_63 {dimension_numbers = #tpu.dot_dimension_numbers<[1], [0], [0], [1], [0, 0, 1, 1], [], []>} : vector<8x8xf32>, vector<8x256xf32>, vector<8x256xf32> -> vector<8x256xf32>
    %228 = arith.addf %217, %227 : vector<8x256xf32>
    %229 = vector.extract_strided_slice %193 {offsets = [0, 255], sizes = [8, 1], strides = [1, 1]} : vector<8x256xf32> to vector<8x1xf32>
    %230 = vector.extract_strided_slice %193 {offsets = [0, 0], sizes = [8, 255], strides = [1, 1]} : vector<8x256xf32> to vector<8x255xf32>
    %231 = tpu.concatenate %229, %230 in 1 : vector<8x1xf32>, vector<8x255xf32> -> vector<8x256xf32>
    %cst_64 = arith.constant 0.000000e+00 : f32
    %232 = vector.shape_cast %8 : vector<1x256xi1> to vector<1x256xi1>
    %233 = vector.broadcast %232 : vector<1x256xi1> to vector<8x256xi1>
    %234 = vector.broadcast %cst_64 : f32 to vector<8x256xf32>
    %235 = arith.select %233, %231, %234 : vector<8x256xi1>, vector<8x256xf32>
    %236 = vector.extract_strided_slice %196 {offsets = [3, 0, 0], sizes = [1, 8, 8], strides = [1, 1, 1]} : vector<9x8x8xf32> to vector<1x8x8xf32>
    %237 = vector.shape_cast %236 : vector<1x8x8xf32> to vector<8x8xf32>
    %cst_65 = arith.constant dense<0.000000e+00> : vector<8x256xf32>
    %238 = tpu.matmul %237, %235, %cst_65 {dimension_numbers = #tpu.dot_dimension_numbers<[1], [0], [0], [1], [0, 0, 1, 1], [], []>} : vector<8x8xf32>, vector<8x256xf32>, vector<8x256xf32> -> vector<8x256xf32>
    %239 = arith.addf %228, %238 : vector<8x256xf32>
    %240 = vector.extract_strided_slice %196 {offsets = [4, 0, 0], sizes = [1, 8, 8], strides = [1, 1, 1]} : vector<9x8x8xf32> to vector<1x8x8xf32>
    %241 = vector.shape_cast %240 : vector<1x8x8xf32> to vector<8x8xf32>
    %cst_66 = arith.constant dense<0.000000e+00> : vector<8x256xf32>
    %242 = tpu.matmul %241, %193, %cst_66 {dimension_numbers = #tpu.dot_dimension_numbers<[1], [0], [0], [1], [0, 0, 1, 1], [], []>} : vector<8x8xf32>, vector<8x256xf32>, vector<8x256xf32> -> vector<8x256xf32>
    %243 = arith.addf %239, %242 : vector<8x256xf32>
    %244 = vector.extract_strided_slice %193 {offsets = [0, 1], sizes = [8, 255], strides = [1, 1]} : vector<8x256xf32> to vector<8x255xf32>
    %245 = vector.extract_strided_slice %193 {offsets = [0, 0], sizes = [8, 1], strides = [1, 1]} : vector<8x256xf32> to vector<8x1xf32>
    %246 = tpu.concatenate %244, %245 in 1 : vector<8x255xf32>, vector<8x1xf32> -> vector<8x256xf32>
    %cst_67 = arith.constant 0.000000e+00 : f32
    %247 = vector.shape_cast %10 : vector<1x256xi1> to vector<1x256xi1>
    %248 = vector.broadcast %247 : vector<1x256xi1> to vector<8x256xi1>
    %249 = vector.broadcast %cst_67 : f32 to vector<8x256xf32>
    %250 = arith.select %248, %246, %249 : vector<8x256xi1>, vector<8x256xf32>
    %251 = vector.extract_strided_slice %196 {offsets = [5, 0, 0], sizes = [1, 8, 8], strides = [1, 1, 1]} : vector<9x8x8xf32> to vector<1x8x8xf32>
    %252 = vector.shape_cast %251 : vector<1x8x8xf32> to vector<8x8xf32>
    %cst_68 = arith.constant dense<0.000000e+00> : vector<8x256xf32>
    %253 = tpu.matmul %252, %250, %cst_68 {dimension_numbers = #tpu.dot_dimension_numbers<[1], [0], [0], [1], [0, 0, 1, 1], [], []>} : vector<8x8xf32>, vector<8x256xf32>, vector<8x256xf32> -> vector<8x256xf32>
    %254 = arith.addf %243, %253 : vector<8x256xf32>
    %255 = vector.extract_strided_slice %193 {offsets = [0, 15], sizes = [8, 241], strides = [1, 1]} : vector<8x256xf32> to vector<8x241xf32>
    %256 = vector.extract_strided_slice %193 {offsets = [0, 0], sizes = [8, 15], strides = [1, 1]} : vector<8x256xf32> to vector<8x15xf32>
    %257 = tpu.concatenate %255, %256 in 1 : vector<8x241xf32>, vector<8x15xf32> -> vector<8x256xf32>
    %cst_69 = arith.constant 0.000000e+00 : f32
    %258 = vector.shape_cast %13 : vector<1x256xi1> to vector<1x256xi1>
    %259 = vector.broadcast %258 : vector<1x256xi1> to vector<8x256xi1>
    %260 = vector.broadcast %cst_69 : f32 to vector<8x256xf32>
    %261 = arith.select %259, %257, %260 : vector<8x256xi1>, vector<8x256xf32>
    %262 = vector.extract_strided_slice %196 {offsets = [6, 0, 0], sizes = [1, 8, 8], strides = [1, 1, 1]} : vector<9x8x8xf32> to vector<1x8x8xf32>
    %263 = vector.shape_cast %262 : vector<1x8x8xf32> to vector<8x8xf32>
    %cst_70 = arith.constant dense<0.000000e+00> : vector<8x256xf32>
    %264 = tpu.matmul %263, %261, %cst_70 {dimension_numbers = #tpu.dot_dimension_numbers<[1], [0], [0], [1], [0, 0, 1, 1], [], []>} : vector<8x8xf32>, vector<8x256xf32>, vector<8x256xf32> -> vector<8x256xf32>
    %265 = arith.addf %254, %264 : vector<8x256xf32>
    %266 = vector.extract_strided_slice %193 {offsets = [0, 16], sizes = [8, 240], strides = [1, 1]} : vector<8x256xf32> to vector<8x240xf32>
    %267 = vector.extract_strided_slice %193 {offsets = [0, 0], sizes = [8, 16], strides = [1, 1]} : vector<8x256xf32> to vector<8x16xf32>
    %268 = tpu.concatenate %266, %267 in 1 : vector<8x240xf32>, vector<8x16xf32> -> vector<8x256xf32>
    %cst_71 = arith.constant 0.000000e+00 : f32
    %269 = vector.shape_cast %6 : vector<1x256xi1> to vector<1x256xi1>
    %270 = vector.broadcast %269 : vector<1x256xi1> to vector<8x256xi1>
    %271 = vector.broadcast %cst_71 : f32 to vector<8x256xf32>
    %272 = arith.select %270, %268, %271 : vector<8x256xi1>, vector<8x256xf32>
    %273 = vector.extract_strided_slice %196 {offsets = [7, 0, 0], sizes = [1, 8, 8], strides = [1, 1, 1]} : vector<9x8x8xf32> to vector<1x8x8xf32>
    %274 = vector.shape_cast %273 : vector<1x8x8xf32> to vector<8x8xf32>
    %cst_72 = arith.constant dense<0.000000e+00> : vector<8x256xf32>
    %275 = tpu.matmul %274, %272, %cst_72 {dimension_numbers = #tpu.dot_dimension_numbers<[1], [0], [0], [1], [0, 0, 1, 1], [], []>} : vector<8x8xf32>, vector<8x256xf32>, vector<8x256xf32> -> vector<8x256xf32>
    %276 = arith.addf %265, %275 : vector<8x256xf32>
    %277 = vector.extract_strided_slice %193 {offsets = [0, 17], sizes = [8, 239], strides = [1, 1]} : vector<8x256xf32> to vector<8x239xf32>
    %278 = vector.extract_strided_slice %193 {offsets = [0, 0], sizes = [8, 17], strides = [1, 1]} : vector<8x256xf32> to vector<8x17xf32>
    %279 = tpu.concatenate %277, %278 in 1 : vector<8x239xf32>, vector<8x17xf32> -> vector<8x256xf32>
    %cst_73 = arith.constant 0.000000e+00 : f32
    %280 = vector.shape_cast %14 : vector<1x256xi1> to vector<1x256xi1>
    %281 = vector.broadcast %280 : vector<1x256xi1> to vector<8x256xi1>
    %282 = vector.broadcast %cst_73 : f32 to vector<8x256xf32>
    %283 = arith.select %281, %279, %282 : vector<8x256xi1>, vector<8x256xf32>
    %284 = vector.extract_strided_slice %196 {offsets = [8, 0, 0], sizes = [1, 8, 8], strides = [1, 1, 1]} : vector<9x8x8xf32> to vector<1x8x8xf32>
    %285 = vector.shape_cast %284 : vector<1x8x8xf32> to vector<8x8xf32>
    %cst_74 = arith.constant dense<0.000000e+00> : vector<8x256xf32>
    %286 = tpu.matmul %285, %283, %cst_74 {dimension_numbers = #tpu.dot_dimension_numbers<[1], [0], [0], [1], [0, 0, 1, 1], [], []>} : vector<8x8xf32>, vector<8x256xf32>, vector<8x256xf32> -> vector<8x256xf32>
    %287 = arith.addf %276, %286 : vector<8x256xf32>
    %288 = arith.index_cast %c0_i32 : i32 to index
    %c0_75 = arith.constant 0 : index
    %c0_76 = arith.constant 0 : index
    %289 = vector.load %arg9[%288, %c0_75, %c0_76] : memref<1x8x1xf32, #tpu.memory_space<vmem>>, vector<1x8x1xf32>
    %290 = vector.shape_cast %289 : vector<1x8x1xf32> to vector<8x1xf32>
    %291 = arith.index_cast %c0_i32 : i32 to index
    %c0_77 = arith.constant 0 : index
    %c0_78 = arith.constant 0 : index
    %292 = vector.load %arg10[%291, %c0_77, %c0_78] : memref<1x8x1xf32, #tpu.memory_space<vmem>>, vector<1x8x1xf32>
    %293 = vector.shape_cast %292 : vector<1x8x1xf32> to vector<8x1xf32>
    %294 = vector.shape_cast %287 : vector<8x256xf32> to vector<1x8x256xf32>
    %cst_79 = arith.constant dense<0.000000e+00> : vector<1x8xf32>
    %295 = vector.multi_reduction <add>, %294, %cst_79 [2] : vector<1x8x256xf32> to vector<1x8xf32>
    %296 = vector.shape_cast %295 : vector<1x8xf32> to vector<1x8x1xf32>
    %cst_80 = arith.constant dense<0.000000e+00> : vector<1x1xf32>
    %297 = vector.multi_reduction <add>, %296, %cst_80 [1] : vector<1x8x1xf32> to vector<1x1xf32>
    %298 = vector.shape_cast %297 : vector<1x1xf32> to vector<1x1x1xf32>
    %cst_81 = arith.constant 4.8828125E-4 : f32
    %299 = vector.broadcast %cst_81 : f32 to vector<1x1x1xf32>
    %300 = arith.mulf %298, %299 : vector<1x1x1xf32>
    %301 = vector.broadcast %300 : vector<1x1x1xf32> to vector<1x8x256xf32>
    %302 = arith.subf %294, %301 : vector<1x8x256xf32>
    %303 = arith.mulf %302, %302 : vector<1x8x256xf32>
    %cst_82 = arith.constant dense<0.000000e+00> : vector<1x8xf32>
    %304 = vector.multi_reduction <add>, %303, %cst_82 [2] : vector<1x8x256xf32> to vector<1x8xf32>
    %305 = vector.shape_cast %304 : vector<1x8xf32> to vector<1x8x1xf32>
    %cst_83 = arith.constant dense<0.000000e+00> : vector<1x1xf32>
    %306 = vector.multi_reduction <add>, %305, %cst_83 [1] : vector<1x8x1xf32> to vector<1x1xf32>
    %307 = vector.shape_cast %306 : vector<1x1xf32> to vector<1x1x1xf32>
    %cst_84 = arith.constant 4.8828125E-4 : f32
    %308 = vector.broadcast %cst_84 : f32 to vector<1x1x1xf32>
    %309 = arith.mulf %307, %308 : vector<1x1x1xf32>
    %cst_85 = arith.constant 9.99999974E-6 : f32
    %310 = vector.broadcast %cst_85 : f32 to vector<1x1x1xf32>
    %311 = arith.addf %309, %310 : vector<1x1x1xf32>
    %312 = math.rsqrt %311 : vector<1x1x1xf32>
    %313 = vector.broadcast %312 : vector<1x1x1xf32> to vector<1x8x256xf32>
    %314 = arith.mulf %302, %313 : vector<1x8x256xf32>
    %315 = vector.shape_cast %314 : vector<1x8x256xf32> to vector<8x256xf32>
    %316 = vector.broadcast %290 : vector<8x1xf32> to vector<8x256xf32>
    %317 = arith.mulf %315, %316 : vector<8x256xf32>
    %318 = vector.broadcast %293 : vector<8x1xf32> to vector<8x256xf32>
    %319 = arith.addf %317, %318 : vector<8x256xf32>
    %320 = arith.negf %319 : vector<8x256xf32>
    %321 = math.exp %320 : vector<8x256xf32>
    %cst_86 = arith.constant 1.000000e+00 : f32
    %322 = vector.broadcast %cst_86 : f32 to vector<8x256xf32>
    %323 = arith.addf %322, %321 : vector<8x256xf32>
    %324 = arith.divf %322, %323 : vector<8x256xf32>
    %325 = arith.mulf %319, %324 : vector<8x256xf32>
    %c2_i32 = arith.constant 2 : i32
    %326 = arith.addi %c2_i32, %c0_i32 : i32
    %327 = arith.index_cast %326 : i32 to index
    %c0_87 = arith.constant 0 : index
    %c0_88 = arith.constant 0 : index
    %328 = vector.load %arg11[%327, %c0_87, %c0_88] : memref<3x16x8xf32, #tpu.memory_space<vmem>>, vector<1x16x8xf32>
    %329 = vector.shape_cast %328 : vector<1x16x8xf32> to vector<16x8xf32>
    %cst_89 = arith.constant dense<0.000000e+00> : vector<16x256xf32>
    %330 = tpu.matmul %329, %325, %cst_89 {dimension_numbers = #tpu.dot_dimension_numbers<[1], [0], [0], [1], [0, 0, 1, 1], [], []>} : vector<16x8xf32>, vector<8x256xf32>, vector<16x256xf32> -> vector<16x256xf32>
    %331 = arith.addf %61, %330 : vector<16x256xf32>
    %c1_i32_90 = arith.constant 1 : i32
    %c0_91 = arith.constant 0 : index
    %c0_92 = arith.constant 0 : index
    %332 = vector.load %arg12[%c0_91, %c0_92] : memref<16x1xf32, #tpu.memory_space<vmem>>, vector<16x1xf32>
    %c0_93 = arith.constant 0 : index
    %c0_94 = arith.constant 0 : index
    %333 = vector.load %arg13[%c0_93, %c0_94] : memref<16x1xf32, #tpu.memory_space<vmem>>, vector<16x1xf32>
    %334 = vector.shape_cast %331 : vector<16x256xf32> to vector<2x8x256xf32>
    %cst_95 = arith.constant dense<0.000000e+00> : vector<2x8xf32>
    %335 = vector.multi_reduction <add>, %334, %cst_95 [2] : vector<2x8x256xf32> to vector<2x8xf32>
    %336 = vector.shape_cast %335 : vector<2x8xf32> to vector<2x8x1xf32>
    %cst_96 = arith.constant dense<0.000000e+00> : vector<2x1xf32>
    %337 = vector.multi_reduction <add>, %336, %cst_96 [1] : vector<2x8x1xf32> to vector<2x1xf32>
    %338 = vector.shape_cast %337 : vector<2x1xf32> to vector<2x1x1xf32>
    %cst_97 = arith.constant 4.8828125E-4 : f32
    %339 = vector.broadcast %cst_97 : f32 to vector<2x1x1xf32>
    %340 = arith.mulf %338, %339 : vector<2x1x1xf32>
    %341 = vector.broadcast %340 : vector<2x1x1xf32> to vector<2x8x256xf32>
    %342 = arith.subf %334, %341 : vector<2x8x256xf32>
    %343 = arith.mulf %342, %342 : vector<2x8x256xf32>
    %cst_98 = arith.constant dense<0.000000e+00> : vector<2x8xf32>
    %344 = vector.multi_reduction <add>, %343, %cst_98 [2] : vector<2x8x256xf32> to vector<2x8xf32>
    %345 = vector.shape_cast %344 : vector<2x8xf32> to vector<2x8x1xf32>
    %cst_99 = arith.constant dense<0.000000e+00> : vector<2x1xf32>
    %346 = vector.multi_reduction <add>, %345, %cst_99 [1] : vector<2x8x1xf32> to vector<2x1xf32>
    %347 = vector.shape_cast %346 : vector<2x1xf32> to vector<2x1x1xf32>
    %cst_100 = arith.constant 4.8828125E-4 : f32
    %348 = vector.broadcast %cst_100 : f32 to vector<2x1x1xf32>
    %349 = arith.mulf %347, %348 : vector<2x1x1xf32>
    %cst_101 = arith.constant 9.99999974E-6 : f32
    %350 = vector.broadcast %cst_101 : f32 to vector<2x1x1xf32>
    %351 = arith.addf %349, %350 : vector<2x1x1xf32>
    %352 = math.rsqrt %351 : vector<2x1x1xf32>
    %353 = vector.broadcast %352 : vector<2x1x1xf32> to vector<2x8x256xf32>
    %354 = arith.mulf %342, %353 : vector<2x8x256xf32>
    %355 = vector.shape_cast %354 : vector<2x8x256xf32> to vector<16x256xf32>
    %356 = vector.broadcast %332 : vector<16x1xf32> to vector<16x256xf32>
    %357 = arith.mulf %355, %356 : vector<16x256xf32>
    %358 = vector.broadcast %333 : vector<16x1xf32> to vector<16x256xf32>
    %359 = arith.addf %357, %358 : vector<16x256xf32>
    %360 = arith.negf %359 : vector<16x256xf32>
    %361 = math.exp %360 : vector<16x256xf32>
    %cst_102 = arith.constant 1.000000e+00 : f32
    %362 = vector.broadcast %cst_102 : f32 to vector<16x256xf32>
    %363 = arith.addf %362, %361 : vector<16x256xf32>
    %364 = arith.divf %362, %363 : vector<16x256xf32>
    %365 = arith.mulf %359, %364 : vector<16x256xf32>
    %c0_103 = arith.constant 0 : index
    %c0_104 = arith.constant 0 : index
    %c0_105 = arith.constant 0 : index
    %366 = vector.load %arg14[%c0_103, %c0_104, %c0_105] : memref<1x16x256xf32, #tpu.memory_space<vmem>>, vector<1x16x256xf32>
    %367 = vector.shape_cast %366 : vector<1x16x256xf32> to vector<16x256xf32>
    %368 = vector.shape_cast %365 : vector<16x256xf32> to vector<1x16x256xf32>
    tpu.vector_store %arg14[%c0_103, %c0_104, %c0_105], %368 {strides = array<i32>} : memref<1x16x256xf32, #tpu.memory_space<vmem>>, vector<1x16x256xf32>,
    return
  }
  func.func @transform_0(%arg0: i32) -> (i32, i32, i32) {
    %c0_i32 = arith.constant 0 : i32
    %c0_i32_0 = arith.constant 0 : i32
    %c0_i32_1 = arith.constant 0 : i32
    return %arg0, %c0_i32, %c0_i32_0 : i32, i32, i32
  }
  func.func @transform_1(%arg0: i32) -> (i32, i32) {
    %c0_i32 = arith.constant 0 : i32
    %c0_i32_0 = arith.constant 0 : i32
    %c0_i32_1 = arith.constant 0 : i32
    return %c0_i32, %c0_i32_0 : i32, i32
  }
  func.func @transform_2(%arg0: i32) -> (i32, i32) {
    %c0_i32 = arith.constant 0 : i32
    %c0_i32_0 = arith.constant 0 : i32
    %c0_i32_1 = arith.constant 0 : i32
    return %c0_i32, %c0_i32_0 : i32, i32
  }
  func.func @transform_3(%arg0: i32) -> (i32, i32) {
    %c0_i32 = arith.constant 0 : i32
    %c0_i32_0 = arith.constant 0 : i32
    %c0_i32_1 = arith.constant 0 : i32
    return %c0_i32, %c0_i32_0 : i32, i32
  }
  func.func @transform_4(%arg0: i32) -> (i32, i32, i32, i32) {
    %c0_i32 = arith.constant 0 : i32
    %c0_i32_0 = arith.constant 0 : i32
    %c0_i32_1 = arith.constant 0 : i32
    %c0_i32_2 = arith.constant 0 : i32
    %c0_i32_3 = arith.constant 0 : i32
    return %c0_i32, %c0_i32_0, %c0_i32_1, %c0_i32_2 : i32, i32, i32, i32
  }
  func.func @transform_5(%arg0: i32) -> (i32, i32, i32) {
    %c0_i32 = arith.constant 0 : i32
    %c0_i32_0 = arith.constant 0 : i32
    %c0_i32_1 = arith.constant 0 : i32
    %c0_i32_2 = arith.constant 0 : i32
    return %c0_i32, %c0_i32_0, %c0_i32_1 : i32, i32, i32
  }
  func.func @transform_6(%arg0: i32) -> (i32, i32, i32) {
    %c0_i32 = arith.constant 0 : i32
    %c0_i32_0 = arith.constant 0 : i32
    %c0_i32_1 = arith.constant 0 : i32
    %c0_i32_2 = arith.constant 0 : i32
    return %c0_i32, %c0_i32_0, %c0_i32_1 : i32, i32, i32
  }
  func.func @transform_7(%arg0: i32) -> (i32, i32, i32, i32) {
    %c0_i32 = arith.constant 0 : i32
    %c0_i32_0 = arith.constant 0 : i32
    %c0_i32_1 = arith.constant 0 : i32
    %c0_i32_2 = arith.constant 0 : i32
    %c0_i32_3 = arith.constant 0 : i32
    return %c0_i32, %c0_i32_0, %c0_i32_1, %c0_i32_2 : i32, i32, i32, i32
  }
  func.func @transform_8(%arg0: i32) -> (i32, i32, i32) {
    %c0_i32 = arith.constant 0 : i32
    %c0_i32_0 = arith.constant 0 : i32
    %c0_i32_1 = arith.constant 0 : i32
    %c0_i32_2 = arith.constant 0 : i32
    return %c0_i32, %c0_i32_0, %c0_i32_1 : i32, i32, i32
  }
  func.func @transform_9(%arg0: i32) -> (i32, i32, i32) {
    %c0_i32 = arith.constant 0 : i32
    %c0_i32_0 = arith.constant 0 : i32
    %c0_i32_1 = arith.constant 0 : i32
    %c0_i32_2 = arith.constant 0 : i32
    return %c0_i32, %c0_i32_0, %c0_i32_1 : i32, i32, i32
  }
  func.func @transform_10(%arg0: i32) -> (i32, i32, i32) {
    %c0_i32 = arith.constant 0 : i32
    %c0_i32_0 = arith.constant 0 : i32
    %c0_i32_1 = arith.constant 0 : i32
    %c0_i32_2 = arith.constant 0 : i32
    return %c0_i32, %c0_i32_0, %c0_i32_1 : i32, i32, i32
  }
  func.func @transform_11(%arg0: i32) -> (i32, i32) {
    %c0_i32 = arith.constant 0 : i32
    %c0_i32_0 = arith.constant 0 : i32
    %c0_i32_1 = arith.constant 0 : i32
    return %c0_i32, %c0_i32_0 : i32, i32
  }
  func.func @transform_12(%arg0: i32) -> (i32, i32) {
    %c0_i32 = arith.constant 0 : i32
    %c0_i32_0 = arith.constant 0 : i32
    %c0_i32_1 = arith.constant 0 : i32
    return %c0_i32, %c0_i32_0 : i32, i32
  }
  func.func @transform_13(%arg0: i32) -> (i32, i32, i32) {
    %c0_i32 = arith.constant 0 : i32
    %c0_i32_0 = arith.constant 0 : i32
    %c0_i32_1 = arith.constant 0 : i32
    return %arg0, %c0_i32, %c0_i32_0 : i32, i32, i32
  }
}

</mosaic_0001>

<bundles_post_ra>
// kernel: tpu_custom_call.1
= control target key start
LH: loop header
LB: loop body
LE: loop exit
PB: predicated region body
PF: predicated region fallthrough
CT: control target
= control target key end

     0   :  { %6 = vsyncpa [#allocation3], 0  ;;  %s115_s0 = inlined_call_operand.hbm [shape: f32[8,256], index: 0, kind: input, shape index: {}]   ;;  %s116_s1 = inlined_call_operand.hbm [shape: f32[8,256], index: 1, kind: output, shape index: {}]  }
   0x1   :  { %7 = vsyncpa [#allocation4], 0  ;;  %s96_s6 = smov [#allocation2]  }
   0x2   :  { %s14_s7 = sshll.u32 %s96_s6, 4  ;;  %s15_s7 = int_to_ptr.vmem [resolvable:$true] %s14_s7 }
   0x3   :  { %s60_s8 = scalar_lea.vmem %s15_s7, 256  ;;  %p65_p1 = scmp.lt.s32.totalorder %s15_s7, %s15_s7 }
   0x4   :  { %p61_p0 = scmp.ne.s32.totalorder %s15_s7, %s60_s8  ;;  %p66_p2 = scmp.lt.s32.totalorder %s60_s8, %s60_s8 }
   0x6   :  { %p67_p3 = por %p66_p2, %p65_p1 }
   0x8   :  { %p68_p4 = pnand %p67_p3, %p61_p0 }
   0xa   :  { %71 = shalt.err (!%p68_p4)
}
   0xb   :  { %17 = dma.hbm_to_vmem [thread:$0]  %s115_s0, 256, %s15_s7, [#allocation3]  }
   0xc   :  { %92 = dma.done.wait [#allocation3], 256  }
   0xd   :  { %93 = vsyncadd [#allocation3], 4294967040  ;;  %v21_v0 = vld [vmem:[#allocation2] sm:$0xff]  ;;  %s97_s11 = smov 1   ;;  %v22_v1 = vld [vmem:[#allocation2 + $0x8] sm:$0xff]  ;;  %v27_v2 = vlaneseq  ;;  %s98_s12 = smov [#allocation5]  }
   0xe   :  { %23 = vrot.lane.b32.xlu0 %v21_v0, %s97_s11  ;;  %s40_s13 = sshll.u32 %s98_s12, 4  ;;  %s41_s13 = int_to_ptr.vmem [resolvable:$true] %s40_s13 }
   0xf   :  { %v28_v3 = vand.u32 127, %v27_v2  ;;  %s72_s0 = scalar_lea.vmem %s41_s13, 256  ;;  %p77_p6 = scmp.lt.s32.totalorder %s41_s13, %s41_s13 }
  0x10   :  { %p73_p5 = scmp.ne.s32.totalorder %s41_s13, %s72_s0  ;;  %p78_p7 = scmp.lt.s32.totalorder %s72_s0, %s72_s0 }
  0x11   :  { %vm29_vm0 = vcmp.lt.s32.totalorder %v28_v3, 1 }
  0x12   :  { %25 = vrot.lane.b32.xlu0 %v22_v1, %s97_s11  ;;  %p79_p8 = por %p78_p7, %p77_p6 }
  0x14   :  { %p80_p9 = pnand %p79_p8, %p73_p5 }
  0x80   :  { %v24_v4 = vpop.permute.xlu0 %23 }
  0x84   :  { %v26_v5 = vpop.permute.xlu0 %25 }
  0x85   :  { %v30_v6 = vsel %vm29_vm0, %v24_v4, %v26_v5  ;;  %v31_v7 = vsel %vm29_vm0, %v26_v5, %v24_v4 }
  0x86   :  { %32 = vst [vmem:[#allocation5] sm:$0xff] %v31_v7  ;;  %33 = vst [vmem:[#allocation5 + $0x8] sm:$0xff] %v30_v6 }
  0x87   :  { %83 = shalt.err (!%p80_p9)
}
  0x88   :  { %43 = dma.vmem_to_hbm [thread:$0]  %s41_s13, 256, %s116_s1, [#allocation4]  }
  0x89   :  { %94 = dma.done.wait [#allocation4], 256  }
  0x8a   :  { %95 = vsyncadd [#allocation4], 4294967040 }
  0x8b   :  { %47 = vsyncpa [#allocation3], 1 }
  0x8c   :  { %48 = vsyncpa [#allocation4], 1 }

// kernel: tpu_custom_call.1
= control target key start
LH: loop header
LB: loop body
LE: loop exit
PB: predicated region body
PF: predicated region fallthrough
CT: control target
= control target key end

     0   :  { %s3676_s0 = inlined_call_operand.vmem [shape: f32[2,16,256], index: 0, kind: input, shape index: {}]   ;;  %s3677_s1 = inlined_call_operand.vmem [shape: f32[16,16], index: 1, kind: input, shape index: {}]   ;;  %s3678_s2 = inlined_call_operand.vmem [shape: f32[16,1], index: 2, kind: input, shape index: {}]   ;;  %s3679_s3 = inlined_call_operand.vmem [shape: f32[16,1], index: 3, kind: input, shape index: {}]   ;;  %s3680_s4 = inlined_call_operand.vmem [shape: f32[1,9,8,8], index: 4, kind: input, shape index: {}]   ;;  %s3681_s5 = inlined_call_operand.vmem [shape: f32[1,8,1], index: 5, kind: input, shape index: {}]   ;;  %s3682_s6 = inlined_call_operand.vmem [shape: f32[1,8,1], index: 6, kind: input, shape index: {}]   ;;  %s3683_s7 = inlined_call_operand.vmem [shape: f32[1,9,8,8], index: 7, kind: input, shape index: {}]   ;;  %s3684_s8 = inlined_call_operand.vmem [shape: f32[1,8,1], index: 8, kind: input, shape index: {}]   ;;  %s3685_s9 = inlined_call_operand.vmem [shape: f32[1,8,1], index: 9, kind: input, shape index: {}]   ;;  %s3686_s10 = inlined_call_operand.vmem [shape: f32[3,16,8], index: 10, kind: input, shape index: {}]   ;;  %s3687_s11 = inlined_call_operand.vmem [shape: f32[16,1], index: 11, kind: input, shape index: {}]   ;;  %s3688_s12 = inlined_call_operand.vmem [shape: f32[16,1], index: 12, kind: input, shape index: {}]   ;;  %s3689_s13 = inlined_call_operand.hbm [shape: f32[2,16,256], index: 13, kind: output, shape index: {}]  }
   0x1   :  { %3702 = sst [smem:[#allocation5_spill]] %s3676_s0 }
   0x2   :  { %3703 = sst [smem:[#allocation6_spill]] %s3677_s1 }
   0x3   :  { %3704 = sst [smem:[#allocation7_spill]] %s3678_s2 }
   0x4   :  { %18 = vsyncpa [#allocation3], 0 }
   0x5   :  { %20 = vsyncpa [#allocation3 + $0x1], 0  ;;  %s3179_s25 = smov 0   ;;  %s3181_s26 = smov 0  }
   0x6   :  { %s3183_s27 = smov 0   ;;  %s3185_s28 = smov 0  }
   0x7 LB: > { %s3200_s29 = sadd.s32 4294967295, %s3095_s28   ;;  %s2837_s30 = sadd.s32 4294967294, %s3095_s28   ;;  %s3095_s28 = sphi %s3185_s28, %s3740_s28   ;;  %s3091_s27 = sphi %s3183_s27, %s3739_s27   ;;  %s3087_s26 = sphi %s3181_s26, %s3738_s26   ;;  %s3083_s25 = sphi %s3179_s25, %s3737_s25  }
   0x8   : > { %s3204_s14 = sadd.s32 1, %s3095_s28   ;;  %s311_s15 = sadd.s32 1, %s3091_s27 }
   0x9   : > { %s308_s16 = ssub.s32 %s3095_s28, %s3204_s14  ;;  %p321_p0 = scmp.ne.s32.totalorder %s3091_s27, %s3087_s26 }
   0xa   : > { %p309_p1 = scmp.eq.s32.totalorder %s308_s16, 0  ;;  %p322_p2 = scmp.eq.s32.totalorder %s3200_s29, 1 }
   0xb   : > { %p327_p3 = scmp.ne.s32.totalorder %s3087_s26, %s3083_s25  ;;  %p328_p4 = scmp.eq.s32.totalorder %s2837_s30, 1 }
   0xc   : > { %s3215_s17 = scalar_select %p309_p1, %s3091_s27, %s311_s15  }
   0xd   : > { %p3217_p5 = por %p322_p2, %p321_p0  ;;  %p3221_p6 = por %p328_p4, %p327_p3 }
   0xe   : > { %p2840_p7 = scmp.ge.s32.totalorder %s3095_s28, 1  ;;  %p390_p8 = scmp.lt.s32.totalorder %s3095_s28, 3 }
  0x10   : > { %p391_p9 = pnand %p2840_p7, %p390_p8 }
  0x11   : > { %p434_p10 = scmp.lt.s32.totalorder (!%p391_p9), %s3200_s29, 1  ;;  %s3707_s0 = sld [smem:[#allocation5_spill]] (!%p391_p9) }
  0x12   : > { %394 = sbr.rel (%p391_p9) target bundleno = 2613 (0xa35), region = 72  ;;  %s3708_s1 = sld [smem:[#allocation6_spill]] (!%p391_p9) }
  0x13   : > { %s3709_s2 = sld [smem:[#allocation7_spill]] (!%p391_p9)  ;;  %s3100_s15 = smov (!%p391_p9), 17  }
  0x14   : > { %s3101_s16 = smov (!%p391_p9), 15   ;;  %s3692_s22 = smov (!%p391_p9), 127  }
  0x15   : > { %s3690_s23 = smov (!%p391_p9), 113   ;;  %s3694_s30 = smov (!%p391_p9), 111  }
  0x17   : > { %v3097_v0 = vmov 0.0   ;;  %s435_s20 = scalar_select %p434_p10, %s3200_s29, 1  ;;  %vm466_vm0 = vcmask 130048   ;;  %v3098_v13 = vmov 0   ;;  %v553_v14 = vld [vmem:[%s3679_s3 + $0x8] sm:$0xff]  ;;  %v552_v16 = vld [vmem:[%s3679_s3] sm:$0xff] }
  0x18   : > { %537 = vmatprep.mubr.f32.mxu0 %v3097_v0  ;;  %748 = vmatprep.mubr.f32.mxu1 %v3097_v0  ;;  %v464_v5 = vld [vmem:[%s3708_s1] sm:$0xff]  ;;  %v465_v6 = vld [vmem:[%s3708_s1 + $0x8] sm:$0xff]  ;;  %vm671_vm1 = vcmask 64512   ;;  %vm854_vm4 = vcmask 138240   ;;  %vm1033_vm8 = vcmask 121856   ;;  %vm3700_vm11 = vcmask 7168  }
  0x19   : > { %s2919_s21 = sshll.u32 %s435_s20, 5  ;;  %2973 = vset.pattern.permute.xlu1 %v3098_v13  ;;  %2974 = vset.pattern.permute.xlu0 %v3098_v13  ;;  %v550_v15 = vld [vmem:[%s3709_s2] sm:$0xff]  ;;  %v551_v31 = vld [vmem:[%s3709_s2 + $0x8] sm:$0xff]  ;;  %s3102_s20 = smov 1   ;;  %vm3698_vm12 = vcmask 1039360   ;;  %vm3699_vm14 = vcmask 924672  }
  0x1a   : > { %s438_s24 = scalar_lea.vmem %s3707_s0, %s2919_s21  ;;  %s3701_s21 = smov 16  }
  0x1b   : > { %v463_v1 = vld [vmem:[%s438_s24 + $0x18] sm:$0xff]  ;;  %v462_v2 = vld [vmem:[%s438_s24 + $0x10] sm:$0xff]  ;;  %v461_v3 = vld [vmem:[%s438_s24 + $0x8] sm:$0xff]  ;;  %s3107_s0 = smov [#allocation2]  }
  0x1c   : > { %501 = vmatprep.subr.mxu0 %v463_v1  ;;  %v460_v4 = vld [vmem:[%s438_s24] sm:$0xff]  ;;  %s3696_s24 = smov 112   ;;  %s3039_s1 = sshll.u32 %s3107_s0, 4  ;;  %s3040_s1 = int_to_ptr.vmem [resolvable:$false] %s3039_s1 }
  0x1d   : > { %502 = vmatpush1.msra.mxu0 %v462_v2  ;;  %s3041_s2 = scalar_lea.vmem %s3040_s1, 1024 }
  0x1e   : > { %503 = vmatprep.subr.mxu0 %v461_v3 }
  0x1f   : > { %504 = vmatpush1.msra.mxu0 %v460_v4 }
  0x20   : > { %2844 = vmatmul.mubr.msk.f32.vlgmr.msra.gmra.mxu0 %vm466_vm0, %v464_v5 }
  0x21   : > { %543 = vmatprep.mubr.f32.mxu0 %v3097_v0 }
  0x24   : > { %2845 = vmatmul.mubr.msk.f32.gmra.mxu0 %vm466_vm0, %v465_v6 }
  0x25   : > { %742 = vmatprep.mubr.f32.mxu0 %v3097_v0 }
  0xe0   : > { %v539_v7 = vpop.f32.mrf.mxu0 }
  0xe2   : > { %v541_v8 = vpop.f32.mrf.mxu0 }
  0xe3   : > { %v554_v12 = vadd.f32 %v541_v8, %v539_v7 }
  0xe4   : > { %v545_v9 = vpop.f32.mrf.mxu0 }
  0xe6   : > { %v547_v10 = vpop.f32.mrf.mxu0 }
  0xe7   : > { %v557_v11 = vadd.f32 %v547_v10, %v545_v9 }
  0xe9   : > { %558 = vadd.xlane.f32.xlu0 %v557_v11 }
  0xed   : > { %555 = vadd.xlane.f32.xlu0 %v554_v12 }
 0x103   : > { %631 = vperm.xlu0 %2974, %v553_v14  }
 0x107   : > { %612 = vperm.xlu0 %2974, %v550_v15  }
 0x10b   : > { %626 = vperm.xlu0 %2974, %v552_v16  }
 0x172   : > { %v559_v17 = vpop.xlane.xlu0 %558 }
 0x173   : > { %v566_v18 = vrot.slane %v559_v17, 4 }
 0x175   : > { %v567_v19 = vadd.f32 %v566_v18, %v559_v17  ;;  %v2850_v18 = vld [vmem:[%s3686_s10 + $0x10] sm:$0xff] }
 0x176   : > { %v556_v30 = vpop.xlane.xlu0 %555 }
 0x177   : > { %v568_v20 = vrot.slane %v567_v19, 2  ;;  %v560_v32 = vrot.slane %v556_v30, 4 }
 0x179   : > { %v569_v21 = vadd.f32 %v568_v20, %v567_v19  ;;  %v561_v33 = vadd.f32 %v560_v32, %v556_v30  ;;  %v2851_v19 = vld [vmem:[%s3686_s10 + $0x18] sm:$0xff] }
 0x17b   : > { %v570_v22 = vrot.slane %v569_v21, 1  ;;  %v562_v34 = vrot.slane %v561_v33, 2 }
 0x17d   : > { %v571_v23 = vadd.f32 %v570_v22, %v569_v21  ;;  %v563_v35 = vadd.f32 %v562_v34, %v561_v33 }
 0x17e   : > { %v632_v59 = vpop.permute.xlu0 %631 }
 0x17f   : > { %v573_v24 = vmul.f32 0.00048828125, %v571_v23  ;;  %v564_v36 = vrot.slane %v563_v35, 1 }
 0x181   : > { %v576_v25 = vsub.f32 %v545_v9, %v573_v24  ;;  %v577_v26 = vsub.f32 %v547_v10, %v573_v24  ;;  %v565_v37 = vadd.f32 %v564_v36, %v563_v35 }
 0x182   : > { %v613_v20 = vpop.permute.xlu0 %612 }
 0x183   : > { %v580_v27 = vmul.f32 %v576_v25, %v576_v25  ;;  %v581_v28 = vmul.f32 %v577_v26, %v577_v26  ;;  %v572_v38 = vmul.f32 0.00048828125, %v565_v37 }
 0x185   : > { %v585_v29 = vadd.f32 %v581_v28, %v580_v27  ;;  %v3256_v39 = vsub.f32 %v539_v7, %v572_v38  ;;  %v3258_v40 = vsub.f32 %v541_v8, %v572_v38 }
 0x187   : > { %586 = vadd.xlane.f32.xlu1 %v585_v29  ;;  %v578_v41 = vmul.f32 %v3256_v39, %v3256_v39  ;;  %v579_v42 = vmul.f32 %v3258_v40, %v3258_v40 }
 0x189   : > { %v582_v43 = vadd.f32 %v579_v42, %v578_v41  ;;  %v439_v41 = vlaneseq }
 0x18b   : > { %v3326_v42 = vand.u32 127, %v439_v41 }
 0x18d   : > { %vm444_vm2 = vcmp.ge.s32.totalorder %v3326_v42, 16 }
 0x198   : > { %617 = vperm.xlu1 %2973, %v551_v31  }
 0x1bc   : > { %583 = vadd.xlane.f32.xlu1 %v582_v43  ;;  %v3329_v43 = vadd.s32 128, %v3326_v42 }
 0x1be   : > { %vm447_vm13 = vcmp.lt.s32.totalorder %v3329_v43, 240 }
 0x210   : > { %v587_v44 = vpop.xlane.xlu1 %586 }
 0x211   : > { %v594_v45 = vrot.slane %v587_v44, 4 }
 0x213   : > { %v595_v46 = vadd.f32 %v594_v45, %v587_v44 }
 0x214   : > { %v618_v54 = vpop.permute.xlu1 %617 }
 0x215   : > { %v596_v47 = vrot.slane %v595_v46, 2 }
 0x217   : > { %v597_v48 = vadd.f32 %v596_v47, %v595_v46  ;;  %v442_v46 = vand.u32 15, %v3326_v42 }
 0x219   : > { %v598_v49 = vrot.slane %v597_v48, 1  ;;  %vm3342_vm3 = vcmp.ge.s32.totalorder %v442_v46, 1  ;;  %vm3361_vm7 = vcmp.le.s32.totalorder %v442_v46, 14 }
 0x21a   : > { %vm3355_vm6 = vmand %vm444_vm2, %vm3342_vm3 }
 0x21b   : > { %v599_v50 = vadd.f32 %v598_v49, %v597_v48  ;;  %v839_v49 = vld [vmem:[%s3680_s4 + $0x8] sm:$0xff]  ;;  %vm3380_vm10 = vmand %vm444_vm2, %vm3361_vm7 }
 0x21d   : > { %v601_v51 = vmul.f32 0.00048828125, %v599_v50  ;;  %v443_v50 = vand.u32 15, %v3329_v43 }
 0x21f   : > { %v603_v52 = vadd.f32 1e-05, %v601_v51  ;;  %vm3347_vm5 = vcmp.ge.s32.totalorder %v443_v50, 1  ;;  %vm3372_vm9 = vcmp.le.s32.totalorder %v443_v50, 14 }
 0x220   : > { %vm3429_vm15 = vmand %vm447_vm13, %vm3347_vm5 }
 0x221   : > { %2975 = vrsqrt.f32 %v603_v52 }
 0x22e   : > { %v2976_v53 = vpop.eup %2975 }
 0x22f   : > { %v608_v55 = vmul.f32 %v2976_v53, %v576_v25  ;;  %v609_v56 = vmul.f32 %v2976_v53, %v577_v26  ;;  %v627_v26 = vpop.permute.xlu0 %626 }
 0x231   : > { %v622_v57 = vmul.f32 %v618_v54, %v608_v55  ;;  %v623_v58 = vmul.f32 %v618_v54, %v609_v56  ;;  %v1719_v54 = vld [vmem:[%s3683_s7 + $0x28] sm:$0xff] }
 0x233   : > { %v636_v60 = vadd.f32 %v632_v59, %v622_v57  ;;  %v637_v61 = vadd.f32 %v632_v59, %v623_v58 }
 0x235   : > { %v2848_v62 = vmul.f32 -1.442695, %v636_v60  ;;  %v2849_v63 = vmul.f32 -1.442695, %v637_v61 }
 0x237   : > { %2977 = vpow2.f32 %v2848_v62 }
 0x238   : > { %2979 = vpow2.f32 %v2849_v63 }
 0x244   : > { %v2978_v1 = vpop.eup %2977 }
 0x245   : > { %v2980_v2 = vpop.eup %2979  ;;  %v652_v3 = vadd.f32 1.0, %v2978_v1  ;;  %v584_v4 = vpop.xlane.xlu1 %583  ;;  %v1718_v1 = vld [vmem:[%s3683_s7 + $0x20] sm:$0xff] }
 0x246   : > { %v653_v5 = vadd.f32 1.0, %v2980_v2  ;;  %v588_v6 = vrot.slane %v584_v4, 4 }
 0x247   : > { %2981 = vrcp.f32 %v652_v3 }
 0x248   : > { %2983 = vrcp.f32 %v653_v5  ;;  %v589_v7 = vadd.f32 %v588_v6, %v584_v4  ;;  %v840_v4 = vld [vmem:[%s3680_s4 + $0x10] sm:$0xff] }
 0x24a   : > { %v590_v8 = vrot.slane %v589_v7, 2 }
 0x24c   : > { %v591_v9 = vadd.f32 %v590_v8, %v589_v7 }
 0x24e   : > { %v592_v10 = vrot.slane %v591_v9, 1 }
 0x250   : > { %v593_v11 = vadd.f32 %v592_v10, %v591_v9  ;;  %v841_v9 = vld [vmem:[%s3680_s4 + $0x18] sm:$0xff]  ;;  %v842_v10 = vld [vmem:[%s3680_s4 + $0x20] sm:$0xff] }
 0x252   : > { %v600_v12 = vmul.f32 0.00048828125, %v593_v11 }
 0x254   : > { %v2982_v13 = vpop.eup %2981  ;;  %v602_v14 = vadd.f32 1e-05, %v600_v12 }
 0x255   : > { %v2984_v15 = vpop.eup %2983  ;;  %v3264_v16 = vmul.f32 %v2982_v13, %v636_v60 }
 0x256   : > { %v3266_v17 = vmul.f32 %v2984_v15, %v637_v61  ;;  %2985 = vrsqrt.f32 %v602_v14  ;;  %v838_v61 = vld [vmem:[%s3680_s4] sm:$0xff]  ;;  %v843_v15 = vld [vmem:[%s3680_s4 + $0x28] sm:$0xff] }
 0x257   : > { %868 = vrot.lane.b32.xlu0 %v3264_v16, %s3701_s21 }
 0x258   : > { %865 = vrot.lane.b32.xlu1 %v3266_v17, %s3701_s21  ;;  %708 = vmatprep.subr.mxu0 %v3266_v17 }
 0x259   : > { %2921 = vmatprep.subr.mxu1 %v3266_v17  ;;  %709 = vmatpush1.msra.mxu0 %v3264_v16 }
 0x25a   : > { %2922 = vmatpush1.msra.mxu1 %v3264_v16  ;;  %2852 = vmatmul.mubr.msk.f32.vlgmr.msra.gmra.mxu0 %vm671_vm1, %v2850_v18 }
 0x25b   : > { %848 = vrot.lane.b32.xlu0 %v3266_v17, %s3100_s15  ;;  %2853 = vmatmul.mubr.msk.f32.vlgmr.msra.gmra.mxu1 %vm671_vm1, %v2851_v19 }
 0x25c   : > { %1031 = vrot.lane.b32.xlu1 %v3264_v16, %s3101_s16  ;;  %825 = vmatprep.mubr.f32.mxu1 %v3097_v0 }
 0x25d   : > { %947 = vmatprep.mubr.f32.mxu0 %v3097_v0 }
 0x25f   : > { %852 = vrot.lane.b32.xlu0 %v3264_v16, %s3100_s15 }
 0x260   : > { %1123 = vrot.lane.b32.xlu1 %v3264_v16, %s3102_s20 }
 0x263   : > { %v2986_v21 = vpop.eup %2985  ;;  %1028 = vrot.lane.b32.xlu0 %v3266_v17, %s3101_s16 }
 0x264   : > { %1290 = vrot.lane.b32.xlu1 %v3266_v17, %s3692_s22  ;;  %v607_v22 = vmul.f32 %v2986_v21, %v3258_v40  ;;  %v606_v23 = vmul.f32 %v2986_v21, %v3256_v39  ;;  %v666_v39 = vld [vmem:[%s3686_s10] sm:$0xff]  ;;  %v667_v40 = vld [vmem:[%s3686_s10 + $0x8] sm:$0xff] }
 0x266   : > { %v621_v24 = vmul.f32 %v613_v20, %v607_v22  ;;  %v620_v25 = vmul.f32 %v613_v20, %v606_v23  ;;  %v844_v20 = vld [vmem:[%s3680_s4 + $0x30] sm:$0xff] }
 0x267   : > { %1120 = vrot.lane.b32.xlu0 %v3266_v17, %s3102_s20 }
 0x268   : > { %1382 = vrot.lane.b32.xlu1 %v3266_v17, %s3690_s23  ;;  %v635_v27 = vadd.f32 %v627_v26, %v621_v24  ;;  %v634_v28 = vadd.f32 %v627_v26, %v620_v25  ;;  %v845_v25 = vld [vmem:[%s3680_s4 + $0x38] sm:$0xff] }
 0x26a   : > { %v2847_v29 = vmul.f32 -1.442695, %v635_v27  ;;  %v2846_v30 = vmul.f32 -1.442695, %v634_v28 }
 0x26b   : > { %1288 = vrot.lane.b32.xlu0 %v3264_v16, %s3692_s22  ;;  %s3728_s22 = smov 112  }
 0x26c   : > { %1474 = vrot.lane.b32.xlu1 %v3266_v17, %s3696_s24  ;;  %2987 = vpow2.f32 %v2847_v29 }
 0x26d   : > { %2989 = vpow2.f32 %v2846_v30 }
 0x26f   : > { %1380 = vrot.lane.b32.xlu0 %v3264_v16, %s3690_s23 }
 0x270   : > { %1566 = vrot.lane.b32.xlu1 %v3266_v17, %s3694_s30 }
 0x273   : > { %1472 = vrot.lane.b32.xlu0 %v3264_v16, %s3696_s24  ;;  %s3726_s24 = smov 127  }
 0x277   : > { %1564 = vrot.lane.b32.xlu0 %v3264_v16, %s3694_s30  ;;  %s3727_s30 = smov 113  }
 0x279   : > { %v2988_v31 = vpop.eup %2987 }
 0x27a   : > { %v2990_v32 = vpop.eup %2989  ;;  %v651_v33 = vadd.f32 1.0, %v2988_v31  ;;  %v846_v31 = vld [vmem:[%s3680_s4 + $0x40] sm:$0xff] }
 0x27b   : > { %v650_v34 = vadd.f32 1.0, %v2990_v32 }
 0x27c   : > { %2991 = vrcp.f32 %v651_v33 }
 0x27d   : > { %2993 = vrcp.f32 %v650_v34 }
 0x289   : > { %v2992_v35 = vpop.eup %2991 }
 0x28a   : > { %v2994_v36 = vpop.eup %2993  ;;  %v663_v37 = vmul.f32 %v2992_v35, %v635_v27 }
 0x28b   : > { %v662_v38 = vmul.f32 %v2994_v36, %v634_v28 }
 0x28c   : > { %791 = vmatprep.subr.mxu1 %v663_v37 }
 0x28d   : > { %792 = vmatpush1.msra.mxu1 %v662_v38 }
 0x28e   : > { %2854 = vmatmul.mubr.msk.f32.vlgmr.msra.gmra.mxu1 %vm671_vm1, %v666_v39 }
 0x28f   : > { %831 = vmatprep.mubr.f32.mxu1 %v3097_v0 }
 0x292   : > { %2855 = vmatmul.mubr.msk.f32.gmra.mxu1 %vm671_vm1, %v667_v40 }
 0x293   : > { %1111 = vmatprep.mubr.f32.mxu1 %v3097_v0 }
 0x2c9   : > { %v869_v44 = vpop.permute.xlu0 %868 }
 0x2ca   : > { %v866_v45 = vpop.permute.xlu1 %865 }
 0x2cb   : > { %v873_v47 = vsel %vm466_vm0, %v866_v45, %v869_v44  ;;  %v870_v48 = vsel %vm466_vm0, %v869_v44, %v866_v45 }
 0x2cc   : > { %913 = vmatprep.subr.mxu0 %v870_v48 }
 0x2cd   : > { %2856 = vmatpush1.msk.msra.mxu0 %vm444_vm2, %v873_v47  ;;  %v849_v51 = vpop.permute.xlu0 %848 }
 0x2ce   : > { %v1032_v52 = vpop.permute.xlu1 %1031  ;;  %2857 = vmatmul.mubr.msk.f32.vlgmr.msra.gmra.mxu0 %vm671_vm1, %v839_v49 }
 0x2cf   : > { %1021 = vmatprep.mubr.f32.mxu0 %v3097_v0 }
 0x2d1   : > { %v853_v55 = vpop.permute.xlu0 %852 }
 0x2d2   : > { %v1124_v57 = vpop.permute.xlu1 %1123  ;;  %v855_v58 = vsel %vm854_vm4, %v853_v55, %v849_v51  ;;  %v858_v59 = vsel %vm854_vm4, %v849_v51, %v853_v55 }
 0x2d3   : > { %2858 = vmatprep.subr.msk.mxu0 %vm3347_vm5, %v855_v58 }
 0x2d4   : > { %2859 = vmatpush1.msk.msra.mxu0 %vm3355_vm6, %v858_v59 }
 0x2d5   : > { %v1029_v63 = vpop.permute.xlu0 %1028  ;;  %2860 = vmatmul.mubr.msk.f32.vlgmr.msra.gmra.mxu0 %vm671_vm1, %v838_v61 }
 0x2d6   : > { %v1034_v2 = vsel %vm1033_vm8, %v1032_v52, %v1029_v63  ;;  %v1037_v3 = vsel %vm1033_vm8, %v1029_v63, %v1032_v52  ;;  %1203 = vmatprep.mubr.f32.mxu0 %v3097_v0  ;;  %v1291_v5 = vpop.permute.xlu1 %1290 }
 0x2d7   : > { %2861 = vmatprep.subr.msk.mxu1 %vm3372_vm9, %v1034_v2 }
 0x2d8   : > { %2862 = vmatpush1.msk.msra.mxu1 %vm3380_vm10, %v1037_v3 }
 0x2d9   : > { %1245 = vmatprep.subr.mxu1 %v3266_v17  ;;  %v1121_v6 = vpop.permute.xlu0 %1120  ;;  %2863 = vmatmul.mubr.msk.f32.vlgmr.msra.gmra.mxu1 %vm671_vm1, %v840_v4 }
 0x2da   : > { %v1126_v7 = vsel %vm3700_vm11, %v1124_v57, %v1121_v6  ;;  %v1129_v8 = vsel %vm3700_vm11, %v1121_v6, %v1124_v57  ;;  %1246 = vmatpush1.msra.mxu1 %v3264_v16  ;;  %1279 = vmatprep.mubr.f32.mxu1 %v3097_v0  ;;  %v1383_v11 = vpop.permute.xlu1 %1382  ;;  %vm3457_vm11 = vmand %vm447_vm13, %vm3372_vm9 }
 0x2db   : > { %2864 = vmatprep.subr.msk.mxu0 %vm3347_vm5, %v1126_v7 }
 0x2dc   : > { %2865 = vmatpush1.msk.msra.mxu0 %vm3342_vm3, %v1129_v8 }
 0x2dd   : > { %2866 = vmatmul.mubr.msk.f32.vlgmr.msra.gmra.mxu0 %vm671_vm1, %v841_v9  ;;  %v1289_v12 = vpop.permute.xlu0 %1288  ;;  %2867 = vmatmul.mubr.msk.f32.vlgmr.msra.gmra.mxu1 %vm671_vm1, %v842_v10 }
 0x2de   : > { %v1293_v13 = vsel %vm3698_vm12, %v1289_v12, %v1291_v5  ;;  %v1297_v14 = vsel %vm3698_vm12, %v1291_v5, %v1289_v12  ;;  %1371 = vmatprep.mubr.f32.mxu0 %v3097_v0  ;;  %1463 = vmatprep.mubr.f32.mxu1 %v3097_v0  ;;  %v1475_v21 = vpop.permute.xlu1 %1474  ;;  %vm1476_vm12 = vcmask 916480  }
 0x2df   : > { %2868 = vmatprep.subr.msk.mxu0 %vm3372_vm9, %v1297_v14 }
 0x2e0   : > { %2869 = vmatpush1.msk.msra.mxu0 %vm3361_vm7, %v1293_v13 }
 0x2e1   : > { %2870 = vmatmul.mubr.msk.f32.vlgmr.msra.gmra.mxu0 %vm671_vm1, %v843_v15  ;;  %v1381_v17 = vpop.permute.xlu0 %1380 }
 0x2e2   : > { %v1385_v18 = vsel %vm3699_vm14, %v1381_v17, %v1383_v11  ;;  %v1389_v19 = vsel %vm3699_vm14, %v1383_v11, %v1381_v17  ;;  %1555 = vmatprep.mubr.f32.mxu0 %v3097_v0  ;;  %vm1568_vm14 = vcmask 908288   ;;  %v1567_v27 = vpop.permute.xlu1 %1566 }
 0x2e3   : > { %2871 = vmatprep.subr.msk.mxu1 %vm3429_vm15, %v1389_v19 }
 0x2e4   : > { %2872 = vmatpush1.msk.msra.mxu1 %vm3342_vm3, %v1385_v18 }
 0x2e5   : > { %2873 = vmatmul.mubr.msk.f32.vlgmr.msra.gmra.mxu1 %vm671_vm1, %v844_v20  ;;  %v1473_v22 = vpop.permute.xlu0 %1472 }
 0x2e6   : > { %v1477_v23 = vsel %vm1476_vm12, %v1473_v22, %v1475_v21  ;;  %v1481_v24 = vsel %vm1476_vm12, %v1475_v21, %v1473_v22  ;;  %1647 = vmatprep.mubr.f32.mxu1 %v3097_v0 }
 0x2e7   : > { %2874 = vmatprep.subr.msk.mxu0 %vm447_vm13, %v1481_v24  ;;  %v1656_v24 = vld [vmem:[%s3681_s5] sm:$0xff] }
 0x2e8   : > { %1522 = vmatpush1.msra.mxu0 %v1477_v23 }
 0x2e9   : > { %2875 = vmatmul.mubr.msk.f32.vlgmr.msra.gmra.mxu0 %vm671_vm1, %v845_v25  ;;  %v1565_v28 = vpop.permute.xlu0 %1564 }
 0x2ea   : > { %v1569_v29 = vsel %vm1568_vm14, %v1565_v28, %v1567_v27  ;;  %v1573_v30 = vsel %vm1568_vm14, %v1567_v27, %v1565_v28  ;;  %1814 = vmatprep.mubr.f32.mxu0 %v3097_v0 }
 0x2eb   : > { %2876 = vmatprep.subr.msk.mxu1 %vm3457_vm11, %v1573_v30 }
 0x2ec   : > { %2877 = vmatpush1.msk.msra.mxu1 %vm3361_vm7, %v1569_v29 }
 0x2ed   : > { %2878 = vmatmul.mubr.msk.f32.vlgmr.msra.gmra.mxu1 %vm671_vm1, %v846_v31 }
 0x2ee   : > { %1888 = vmatprep.mubr.f32.mxu1 %v3097_v0 }
 0x31a   : > { %v744_v34 = vpop.f32.mrf.mxu0 }
 0x31b   : > { %v750_v32 = vpop.f32.mrf.mxu1 }
 0x31c   : > { %v746_v38 = vpop.f32.mrf.mxu0 }
 0x31d   : > { %v3474_v33 = vpop.f32.mrf.mxu1 }
 0x34e   : > { %v827_v35 = vpop.f32.mrf.mxu1 }
 0x34f   : > { %v3476_v36 = vadd.f32 %v827_v35, %v744_v34 }
 0x350   : > { %v829_v37 = vpop.f32.mrf.mxu1 }
 0x351   : > { %v3478_v39 = vadd.f32 %v829_v37, %v746_v38 }
 0x352   : > { %v833_v40 = vpop.f32.mrf.mxu1 }
 0x353   : > { %v3480_v41 = vadd.f32 %v833_v40, %v750_v32 }
 0x354   : > { %v3482_v47 = vpop.f32.mrf.mxu1 }
 0x38e   : > { %v949_v44 = vpop.f32.mrf.mxu0 }
 0x390   : > { %v951_v45 = vpop.f32.mrf.mxu0 }
 0x395   : > { %v1023_v46 = vpop.f32.mrf.mxu0 }
 0x396   : > { %v1024_v49 = vadd.f32 %v1023_v46, %v949_v44 }
 0x397   : > { %v1025_v48 = vpop.f32.mrf.mxu0 }
 0x398   : > { %v1026_v51 = vadd.f32 %v1025_v48, %v951_v45  ;;  %v1657_v45 = vld [vmem:[%s3682_s6] sm:$0xff] }
 0x399   : > { %v1113_v50 = vpop.f32.mrf.mxu1 }
 0x39a   : > { %v1118_v55 = vadd.f32 %v1113_v50, %v1024_v49 }
 0x39b   : > { %v1115_v52 = vpop.f32.mrf.mxu1 }
 0x39c   : > { %v1119_v58 = vadd.f32 %v1115_v52, %v1026_v51 }
 0x39d   : > { %v1205_v57 = vpop.f32.mrf.mxu0  ;;  %v1281_v61 = vpop.f32.mrf.mxu1 }
 0x39e   : > { %v1210_v63 = vadd.f32 %v1205_v57, %v1118_v55 }
 0x39f   : > { %v1207_v59 = vpop.f32.mrf.mxu0  ;;  %v1283_v3 = vpop.f32.mrf.mxu1 }
 0x3a0   : > { %v1211_v2 = vadd.f32 %v1207_v59, %v1119_v58  ;;  %v1286_v5 = vadd.f32 %v1281_v61, %v1210_v63 }
 0x3a1   : > { %v1373_v4 = vpop.f32.mrf.mxu0 }
 0x3a2   : > { %v1287_v7 = vadd.f32 %v1283_v3, %v1211_v2  ;;  %v1378_v9 = vadd.f32 %v1373_v4, %v1286_v5 }
 0x3a3   : > { %v1375_v8 = vpop.f32.mrf.mxu0 }
 0x3a4   : > { %v1379_v12 = vadd.f32 %v1375_v8, %v1287_v7 }
 0x3a5   : > { %v1465_v6 = vpop.f32.mrf.mxu1 }
 0x3a6   : > { %v1470_v14 = vadd.f32 %v1465_v6, %v1378_v9 }
 0x3a7   : > { %v1467_v10 = vpop.f32.mrf.mxu1 }
 0x3a8   : > { %v1471_v15 = vadd.f32 %v1467_v10, %v1379_v12 }
 0x3a9   : > { %v1557_v11 = vpop.f32.mrf.mxu0 }
 0x3aa   : > { %v1562_v18 = vadd.f32 %v1557_v11, %v1470_v14 }
 0x3ab   : > { %v1559_v13 = vpop.f32.mrf.mxu0 }
 0x3ac   : > { %v1563_v19 = vadd.f32 %v1559_v13, %v1471_v15 }
 0x3ad   : > { %v1649_v17 = vpop.f32.mrf.mxu1 }
 0x3ae   : > { %v1654_v21 = vadd.f32 %v1649_v17, %v1562_v18 }
 0x3af   : > { %v1651_v20 = vpop.f32.mrf.mxu1 }
 0x3b0   : > { %v1655_v22 = vadd.f32 %v1651_v20, %v1563_v19 }
 0x3b2   : > { %v1658_v23 = vadd.f32 %v1655_v22, %v1654_v21 }
 0x3b4   : > { %1659 = vadd.xlane.f32.xlu0 %v1658_v23  ;;  %v1715_v23 = vld [vmem:[%s3683_s7 + $0x8] sm:$0xff] }
 0x3ca   : > { %1688 = vperm.xlu0 %2974, %v1656_v24  }
 0x43d   : > { %v1660_v25 = vpop.xlane.xlu0 %1659 }
 0x43e   : > { %v1661_v27 = vrot.slane %v1660_v25, 4 }
 0x440   : > { %v1662_v28 = vadd.f32 %v1661_v27, %v1660_v25 }
 0x442   : > { %v1663_v29 = vrot.slane %v1662_v28, 2 }
 0x444   : > { %v1664_v30 = vadd.f32 %v1663_v29, %v1662_v28  ;;  %v1714_v29 = vld [vmem:[%s3683_s7] sm:$0xff] }
 0x445   : > { %v1689_v2 = vpop.permute.xlu0 %1688 }
 0x446   : > { %v1665_v31 = vrot.slane %v1664_v30, 1 }
 0x448   : > { %v1666_v32 = vadd.f32 %v1665_v31, %v1664_v30 }
 0x44a   : > { %v1667_v34 = vmul.f32 0.00048828125, %v1666_v32 }
 0x44c   : > { %v1668_v35 = vsub.f32 %v1654_v21, %v1667_v34  ;;  %v1669_v37 = vsub.f32 %v1655_v22, %v1667_v34  ;;  %v1716_v34 = vld [vmem:[%s3683_s7 + $0x10] sm:$0xff] }
 0x44e   : > { %v1670_v38 = vmul.f32 %v1668_v35, %v1668_v35  ;;  %v1671_v40 = vmul.f32 %v1669_v37, %v1669_v37 }
 0x450   : > { %v1672_v44 = vadd.f32 %v1671_v40, %v1670_v38  ;;  %v1717_v40 = vld [vmem:[%s3683_s7 + $0x18] sm:$0xff] }
 0x452   : > { %1673 = vadd.xlane.f32.xlu1 %v1672_v44 }
 0x463   : > { %1695 = vperm.xlu1 %2973, %v1657_v45  }
 0x4db   : > { %v1674_v46 = vpop.xlane.xlu1 %1673 }
 0x4dc   : > { %v1675_v48 = vrot.slane %v1674_v46, 4 }
 0x4de   : > { %v1676_v49 = vadd.f32 %v1675_v48, %v1674_v46 }
 0x4df   : > { %v1696_v5 = vpop.permute.xlu1 %1695 }
 0x4e0   : > { %v1677_v50 = vrot.slane %v1676_v49, 2 }
 0x4e2   : > { %v1678_v51 = vadd.f32 %v1677_v50, %v1676_v49 }
 0x4e4   : > { %v1679_v52 = vrot.slane %v1678_v51, 1 }
 0x4e6   : > { %v1680_v55 = vadd.f32 %v1679_v52, %v1678_v51 }
 0x4e8   : > { %v1681_v57 = vmul.f32 0.00048828125, %v1680_v55  ;;  %v1720_v55 = vld [vmem:[%s3683_s7 + $0x30] sm:$0xff] }
 0x4ea   : > { %v1682_v58 = vadd.f32 1e-05, %v1681_v57 }
 0x4ec   : > { %2995 = vrsqrt.f32 %v1682_v58 }
 0x4f9   : > { %v2996_v59 = vpop.eup %2995 }
 0x4fa   : > { %v1684_v61 = vmul.f32 %v2996_v59, %v1668_v35  ;;  %v1685_v63 = vmul.f32 %v2996_v59, %v1669_v37 }
 0x4fc   : > { %v1691_v3 = vmul.f32 %v1689_v2, %v1684_v61  ;;  %v1692_v4 = vmul.f32 %v1689_v2, %v1685_v63  ;;  %v1721_v61 = vld [vmem:[%s3683_s7 + $0x38] sm:$0xff] }
 0x4fe   : > { %v1698_v6 = vadd.f32 %v1696_v5, %v1691_v3  ;;  %v1699_v7 = vadd.f32 %v1696_v5, %v1692_v4  ;;  %v1722_v3 = vld [vmem:[%s3683_s7 + $0x40] sm:$0xff] }
 0x500   : > { %v2879_v8 = vmul.f32 -1.442695, %v1698_v6  ;;  %v2880_v9 = vmul.f32 -1.442695, %v1699_v7 }
 0x502   : > { %2997 = vpow2.f32 %v2879_v8 }
 0x503   : > { %2999 = vpow2.f32 %v2880_v9 }
 0x50f   : > { %v2998_v10 = vpop.eup %2997 }
 0x510   : > { %v3000_v11 = vpop.eup %2999  ;;  %v1706_v12 = vadd.f32 1.0, %v2998_v10 }
 0x511   : > { %v1707_v13 = vadd.f32 1.0, %v3000_v11 }
 0x512   : > { %3001 = vrcp.f32 %v1706_v12 }
 0x513   : > { %3003 = vrcp.f32 %v1707_v13 }
 0x51f   : > { %v3002_v14 = vpop.eup %3001 }
 0x520   : > { %v3004_v15 = vpop.eup %3003  ;;  %v1712_v17 = vmul.f32 %v3002_v14, %v1698_v6 }
 0x521   : > { %v1713_v18 = vmul.f32 %v3004_v15, %v1699_v7 }
 0x522   : > { %1739 = vrot.lane.b32.xlu1 %v1712_v17, %s3701_s21 }
 0x523   : > { %1736 = vrot.lane.b32.xlu0 %v1713_v18, %s3701_s21 }
 0x526   : > { %1728 = vrot.lane.b32.xlu1 %v1712_v17, %s3100_s15 }
 0x527   : > { %1724 = vrot.lane.b32.xlu0 %v1713_v18, %s3100_s15  ;;  %s3729_s15 = smov 111  }
 0x52a   : > { %1898 = vrot.lane.b32.xlu1 %v1712_v17, %s3101_s16 }
 0x52b   : > { %1895 = vrot.lane.b32.xlu0 %v1713_v18, %s3101_s16 }
 0x52e   : > { %1985 = vrot.lane.b32.xlu1 %v1712_v17, %s3102_s20 }
 0x52f   : > { %1982 = vrot.lane.b32.xlu0 %v1713_v18, %s3102_s20 }
 0x532   : > { %2147 = vrot.lane.b32.xlu1 %v1713_v18, %s3726_s24 }
 0x533   : > { %2145 = vrot.lane.b32.xlu0 %v1712_v17, %s3726_s24  ;;  %s2920_s24 = sshll.u32 %s3200_s29, 9 }
 0x534   : > { %s3633_s21 = scalar_lea.hbm %s3689_s13, %s2920_s24 }
 0x536   : > { %2234 = vrot.lane.b32.xlu1 %v1713_v18, %s3727_s30 }
 0x537   : > { %2232 = vrot.lane.b32.xlu0 %v1712_v17, %s3727_s30 }
 0x53a   : > { %2321 = vrot.lane.b32.xlu1 %v1713_v18, %s3728_s22 }
 0x53b   : > { %2319 = vrot.lane.b32.xlu0 %v1712_v17, %s3728_s22 }
 0x53e   : > { %2408 = vrot.lane.b32.xlu1 %v1713_v18, %s3729_s15 }
 0x53f   : > { %2406 = vrot.lane.b32.xlu0 %v1712_v17, %s3729_s15  ;;  %s431_s15 = sand.u32 1, %s3087_s26  }
 0x540   : > { %s2841_s16 = sshll.u32 %s431_s15, 5 }
 0x541   : > { %s433_s20 = scalar_lea.vmem [#allocation2], %s2841_s16  ;;  %s3635_s16 = scalar_lea.sflag [#allocation3], %s431_s15 }
 0x542   : > { %s2775_s23 = sshll.u32 %s433_s20, 4  ;;  %s3628_s23 = int_to_ptr.vmem [resolvable:$true] %s2775_s23 }
 0x543   : > { %s3035_s29 = scalar_lea.vmem %s3628_s23, 512  ;;  %p3042_p0 = scmp.lt.s32.totalorder %s3628_s23, %s3040_s1 }
 0x544   : > { %p3036_p11 = scmp.ne.s32.totalorder %s3628_s23, %s3035_s29  ;;  %p3043_p1 = scmp.lt.s32.totalorder %s3041_s2, %s3035_s29 }
 0x546   : > { %p3037_p12 = pnand %p3036_p11, %p3217_p5  ;;  %p3044_p2 = por %p3043_p1, %p3042_p0 }
 0x548   : > { %p3038_p13 = pneg %p3037_p12 }
 0x54a   : > { %p3045_p3 = pnand %p3044_p2, %p3038_p13 }
 0x594   : > { %v1740_v19 = vpop.permute.xlu1 %1739 }
 0x595   : > { %v1737_v20 = vpop.permute.xlu0 %1736 }
 0x596   : > { %v1744_v21 = vsel %vm466_vm0, %v1737_v20, %v1740_v19  ;;  %v1741_v22 = vsel %vm466_vm0, %v1740_v19, %v1737_v20  ;;  %vm3730_vm0 = vcmask 7168  }
 0x597   : > { %1780 = vmatprep.subr.mxu0 %v1741_v22 }
 0x598   : > { %2881 = vmatpush1.msk.msra.mxu0 %vm444_vm2, %v1744_v21  ;;  %v1729_v24 = vpop.permute.xlu1 %1728  ;;  %vm3731_vm2 = vmmov %vm3730_vm0 }
 0x599   : > { %v1725_v25 = vpop.permute.xlu0 %1724  ;;  %2882 = vmatmul.mubr.msk.f32.vlgmr.msra.gmra.mxu0 %vm671_vm1, %v1715_v23 }
 0x59a   : > { %v1730_v27 = vsel %vm854_vm4, %v1729_v24, %v1725_v25  ;;  %v1733_v28 = vsel %vm854_vm4, %v1725_v25, %v1729_v24  ;;  %1973 = vmatprep.mubr.f32.mxu0 %v3097_v0  ;;  %vm3732_vm4 = vcmask 1039360  }
 0x59b   : > { %2883 = vmatprep.subr.msk.mxu1 %vm3347_vm5, %v1730_v27 }
 0x59c   : > { %2884 = vmatpush1.msk.msra.mxu1 %vm3355_vm6, %v1733_v28  ;;  %v1899_v42 = vpop.permute.xlu1 %1898  ;;  %vm3733_vm6 = vmmov %vm3732_vm4 }
 0x59d   : > { %v1896_v30 = vpop.permute.xlu0 %1895  ;;  %2885 = vmatmul.mubr.msk.f32.vlgmr.msra.gmra.mxu1 %vm671_vm1, %v1714_v29 }
 0x59e   : > { %v1900_v31 = vsel %vm1033_vm8, %v1899_v42, %v1896_v30  ;;  %v1903_v32 = vsel %vm1033_vm8, %v1896_v30, %v1899_v42  ;;  %2060 = vmatprep.mubr.f32.mxu1 %v3097_v0 }
 0x59f   : > { %2886 = vmatprep.subr.msk.mxu0 %vm3372_vm9, %v1900_v31 }
 0x5a0   : > { %2887 = vmatpush1.msk.msra.mxu0 %vm3380_vm10, %v1903_v32  ;;  %v1986_v56 = vpop.permute.xlu1 %1985 }
 0x5a1   : > { %v1983_v35 = vpop.permute.xlu0 %1982  ;;  %2102 = vmatprep.subr.mxu0 %v1713_v18  ;;  %2888 = vmatmul.mubr.msk.f32.vlgmr.msra.gmra.mxu0 %vm671_vm1, %v1716_v34 }
 0x5a2   : > { %v1987_v37 = vsel %vm3730_vm0, %v1986_v56, %v1983_v35  ;;  %v1990_v38 = vsel %vm3731_vm2, %v1983_v35, %v1986_v56  ;;  %2103 = vmatpush1.msra.mxu0 %v1712_v17  ;;  %2136 = vmatprep.mubr.f32.mxu0 %v3097_v0 }
 0x5a3   : > { %2889 = vmatprep.subr.msk.mxu1 %vm3347_vm5, %v1987_v37  ;;  %vm3734_vm5 = vcmask 924672  }
 0x5a4   : > { %2890 = vmatpush1.msk.msra.mxu1 %vm3342_vm3, %v1990_v38  ;;  %v2148_v44 = vpop.permute.xlu1 %2147  ;;  %vm3735_vm8 = vmmov %vm3734_vm5  ;;  %v2493_v38 = vld [vmem:[%s3684_s8] sm:$0xff] }
 0x5a5   : > { %v2146_v45 = vpop.permute.xlu0 %2145  ;;  %2891 = vmatmul.mubr.msk.f32.vlgmr.msra.gmra.mxu1 %vm671_vm1, %v1717_v40  ;;  %2892 = vmatmul.mubr.msk.f32.vlgmr.msra.gmra.mxu0 %vm671_vm1, %v1718_v1 }
 0x5a6   : > { %v2149_v46 = vsel %vm3732_vm4, %v2146_v45, %v2148_v44  ;;  %v2153_v48 = vsel %vm3733_vm6, %v2148_v44, %v2146_v45  ;;  %2223 = vmatprep.mubr.f32.mxu1 %v3097_v0  ;;  %2310 = vmatprep.mubr.f32.mxu0 %v3097_v0 }
 0x5a7   : > { %2893 = vmatprep.subr.msk.mxu1 %vm3372_vm9, %v2153_v48 }
 0x5a8   : > { %2894 = vmatpush1.msk.msra.mxu1 %vm3361_vm7, %v2149_v46  ;;  %v2235_v49 = vpop.permute.xlu1 %2234 }
 0x5a9   : > { %v2233_v50 = vpop.permute.xlu0 %2232  ;;  %2895 = vmatmul.mubr.msk.f32.vlgmr.msra.gmra.mxu1 %vm671_vm1, %v1719_v54 }
 0x5aa   : > { %v2236_v51 = vsel %vm3734_vm5, %v2233_v50, %v2235_v49  ;;  %v2240_v52 = vsel %vm3735_vm8, %v2235_v49, %v2233_v50  ;;  %2397 = vmatprep.mubr.f32.mxu1 %v3097_v0 }
 0x5ab   : > { %2896 = vmatprep.subr.msk.mxu0 %vm3429_vm15, %v2240_v52 }
 0x5ac   : > { %2897 = vmatpush1.msk.msra.mxu0 %vm3342_vm3, %v2236_v51  ;;  %v2322_v62 = vpop.permute.xlu1 %2321 }
 0x5ad   : > { %v2320_v57 = vpop.permute.xlu0 %2319  ;;  %2898 = vmatmul.mubr.msk.f32.vlgmr.msra.gmra.mxu0 %vm671_vm1, %v1720_v55 }
 0x5ae   : > { %v2323_v58 = vsel %vm1476_vm12, %v2320_v57, %v2322_v62  ;;  %v2327_v59 = vsel %vm1476_vm12, %v2322_v62, %v2320_v57  ;;  %2484 = vmatprep.mubr.f32.mxu0 %v3097_v0  ;;  %v2494_v57 = vld [vmem:[%s3685_s9] sm:$0xff] }
 0x5af   : > { %2899 = vmatprep.subr.msk.mxu1 %vm447_vm13, %v2327_v59 }
 0x5b0   : > { %2364 = vmatpush1.msra.mxu1 %v2323_v58  ;;  %v2409_v53 = vpop.permute.xlu1 %2408 }
 0x5b1   : > { %v2407_v16 = vpop.permute.xlu0 %2406  ;;  %2900 = vmatmul.mubr.msk.f32.vlgmr.msra.gmra.mxu1 %vm671_vm1, %v1721_v61 }
 0x5b2   : > { %v2410_v63 = vsel %vm1568_vm14, %v2407_v16, %v2409_v53  ;;  %v2414_v2 = vsel %vm1568_vm14, %v2409_v53, %v2407_v16  ;;  %2624 = vmatprep.mubr.f32.mxu1 %v3097_v0 }
 0x5b3   : > { %2901 = vmatprep.subr.msk.mxu0 %vm3457_vm11, %v2414_v2 }
 0x5b4   : > { %2902 = vmatpush1.msk.msra.mxu0 %vm3361_vm7, %v2410_v63 }
 0x5b5   : > { %2903 = vmatmul.mubr.msk.f32.vlgmr.msra.gmra.mxu0 %vm671_vm1, %v1722_v3 }
 0x659   : > { %v1816_v43 = vpop.f32.mrf.mxu0 }
 0x65b   : > { %v1818_v4 = vpop.f32.mrf.mxu0 }
 0x65d   : > { %v1890_v5 = vpop.f32.mrf.mxu1 }
 0x65e   : > { %v1891_v6 = vadd.f32 %v1890_v5, %v1816_v43 }
 0x65f   : > { %v1892_v7 = vpop.f32.mrf.mxu1 }
 0x660   : > { %v1893_v8 = vadd.f32 %v1892_v7, %v1818_v4 }
 0x661   : > { %v1975_v9 = vpop.f32.mrf.mxu0 }
 0x662   : > { %v1980_v10 = vadd.f32 %v1975_v9, %v1891_v6 }
 0x663   : > { %v1977_v11 = vpop.f32.mrf.mxu0 }
 0x664   : > { %v1981_v12 = vadd.f32 %v1977_v11, %v1893_v8 }
 0x665   : > { %v2062_v13 = vpop.f32.mrf.mxu1  ;;  %v2138_v14 = vpop.f32.mrf.mxu0 }
 0x666   : > { %v2067_v15 = vadd.f32 %v2062_v13, %v1980_v10 }
 0x667   : > { %v2064_v26 = vpop.f32.mrf.mxu1  ;;  %v2140_v18 = vpop.f32.mrf.mxu0 }
 0x668   : > { %v2068_v17 = vadd.f32 %v2064_v26, %v1981_v12  ;;  %v2143_v19 = vadd.f32 %v2138_v14, %v2067_v15 }
 0x669   : > { %v2225_v60 = vpop.f32.mrf.mxu1 }
 0x66a   : > { %v2144_v20 = vadd.f32 %v2140_v18, %v2068_v17  ;;  %v2230_v23 = vadd.f32 %v2225_v60, %v2143_v19 }
 0x66b   : > { %v2227_v21 = vpop.f32.mrf.mxu1 }
 0x66c   : > { %v2231_v24 = vadd.f32 %v2227_v21, %v2144_v20 }
 0x66d   : > { %v2312_v22 = vpop.f32.mrf.mxu0 }
 0x66e   : > { %v2317_v28 = vadd.f32 %v2312_v22, %v2230_v23  ;;  %v2906_v22 = vld [vmem:[%s3686_s10 + $0x20] sm:$0xff]  ;;  %v2907_v23 = vld [vmem:[%s3686_s10 + $0x28] sm:$0xff] }
 0x66f   : > { %v2314_v25 = vpop.f32.mrf.mxu0 }
 0x670   : > { %v2318_v42 = vadd.f32 %v2314_v25, %v2231_v24 }
 0x671   : > { %v2399_v27 = vpop.f32.mrf.mxu1 }
 0x672   : > { %v2404_v31 = vadd.f32 %v2399_v27, %v2317_v28 }
 0x673   : > { %v2401_v29 = vpop.f32.mrf.mxu1 }
 0x674   : > { %v2405_v32 = vadd.f32 %v2401_v29, %v2318_v42  ;;  %v836_v42 = vadd.f32 %v3482_v47, %v3474_v33  ;;  %v2644_v33 = vld [vmem:[%s3688_s12 + $0x8] sm:$0xff] }
 0x675   : > { %v2486_v30 = vpop.f32.mrf.mxu0 }
 0x676   : > { %v2491_v56 = vadd.f32 %v2486_v30, %v2404_v31 }
 0x677   : > { %v2488_v34 = vpop.f32.mrf.mxu0 }
 0x678   : > { %v2492_v35 = vadd.f32 %v2488_v34, %v2405_v32 }
 0x67a   : > { %v2495_v37 = vadd.f32 %v2492_v35, %v2491_v56 }
 0x67c   : > { %2496 = vadd.xlane.f32.xlu0 %v2495_v37 }
 0x692   : > { %2525 = vperm.xlu0 %2974, %v2493_v38  }
 0x705   : > { %v2497_v40 = vpop.xlane.xlu0 %2496 }
 0x706   : > { %v2498_v1 = vrot.slane %v2497_v40, 4 }
 0x708   : > { %v2499_v44 = vadd.f32 %v2498_v1, %v2497_v40 }
 0x70a   : > { %v2500_v45 = vrot.slane %v2499_v44, 2 }
 0x70c   : > { %v2501_v46 = vadd.f32 %v2500_v45, %v2499_v44 }
 0x70d   : > { %v2526_v7 = vpop.permute.xlu0 %2525 }
 0x70e   : > { %v2502_v48 = vrot.slane %v2501_v46, 1 }
 0x710   : > { %v2503_v54 = vadd.f32 %v2502_v48, %v2501_v46 }
 0x712   : > { %v2504_v49 = vmul.f32 0.00048828125, %v2503_v54 }
 0x714   : > { %v2505_v50 = vsub.f32 %v2491_v56, %v2504_v49  ;;  %v2506_v51 = vsub.f32 %v2492_v35, %v2504_v49  ;;  %v2641_v56 = vld [vmem:[%s3687_s11] sm:$0xff] }
 0x716   : > { %v2507_v52 = vmul.f32 %v2505_v50, %v2505_v50  ;;  %v2508_v55 = vmul.f32 %v2506_v51, %v2506_v51 }
 0x718   : > { %v2509_v62 = vadd.f32 %v2508_v55, %v2507_v52 }
 0x71a   : > { %2510 = vadd.xlane.f32.xlu1 %v2509_v62 }
 0x72b   : > { %2532 = vperm.xlu1 %2973, %v2494_v57  }
 0x7a3   : > { %v2511_v58 = vpop.xlane.xlu1 %2510 }
 0x7a4   : > { %v2512_v59 = vrot.slane %v2511_v58, 4 }
 0x7a6   : > { %v2513_v61 = vadd.f32 %v2512_v59, %v2511_v58 }
 0x7a7   : > { %v2533_v10 = vpop.permute.xlu1 %2532 }
 0x7a8   : > { %v2514_v53 = vrot.slane %v2513_v61, 2 }
 0x7aa   : > { %v2515_v16 = vadd.f32 %v2514_v53, %v2513_v61 }
 0x7ac   : > { %v2516_v63 = vrot.slane %v2515_v16, 1 }
 0x7ae   : > { %v2517_v2 = vadd.f32 %v2516_v63, %v2515_v16 }
 0x7b0   : > { %v2518_v3 = vmul.f32 0.00048828125, %v2517_v2  ;;  %v2642_v2 = vld [vmem:[%s3687_s11 + $0x8] sm:$0xff] }
 0x7b2   : > { %v2519_v43 = vadd.f32 1e-05, %v2518_v3 }
 0x7b4   : > { %3005 = vrsqrt.f32 %v2519_v43 }
 0x7c1   : > { %v3006_v4 = vpop.eup %3005 }
 0x7c2   : > { %v2521_v5 = vmul.f32 %v3006_v4, %v2505_v50  ;;  %v2522_v6 = vmul.f32 %v3006_v4, %v2506_v51 }
 0x7c4   : > { %v2528_v8 = vmul.f32 %v2526_v7, %v2521_v5  ;;  %v2529_v9 = vmul.f32 %v2526_v7, %v2522_v6 }
 0x7c6   : > { %v2535_v11 = vadd.f32 %v2533_v10, %v2528_v8  ;;  %v2536_v12 = vadd.f32 %v2533_v10, %v2529_v9 }
 0x7c8   : > { %v2904_v13 = vmul.f32 -1.442695, %v2535_v11  ;;  %v2905_v14 = vmul.f32 -1.442695, %v2536_v12 }
 0x7ca   : > { %3007 = vpow2.f32 %v2904_v13 }
 0x7cb   : > { %3009 = vpow2.f32 %v2905_v14 }
 0x7d7   : > { %v3008_v15 = vpop.eup %3007 }
 0x7d8   : > { %v3010_v26 = vpop.eup %3009  ;;  %v2543_v17 = vadd.f32 1.0, %v3008_v15 }
 0x7d9   : > { %v2544_v18 = vadd.f32 1.0, %v3010_v26 }
 0x7da   : > { %3011 = vrcp.f32 %v2543_v17 }
 0x7db   : > { %3013 = vrcp.f32 %v2544_v18 }
 0x7e7   : > { %v3012_v60 = vpop.eup %3011 }
 0x7e8   : > { %v3014_v19 = vpop.eup %3013  ;;  %v2549_v20 = vmul.f32 %v3012_v60, %v2535_v11 }
 0x7e9   : > { %v2550_v21 = vmul.f32 %v3014_v19, %v2536_v12 }
 0x7eb   : > { %2590 = vmatprep.subr.mxu1 %v2550_v21 }
 0x7ec   : > { %2591 = vmatpush1.msra.mxu1 %v2549_v20 }
 0x7ed   : > { %2908 = vmatmul.mubr.msk.f32.vlgmr.msra.gmra.mxu1 %vm671_vm1, %v2906_v22 }
 0x7ee   : > { %2630 = vmatprep.mubr.f32.mxu1 %v3097_v0 }
 0x7f1   : > { %2909 = vmatmul.mubr.msk.f32.gmra.mxu1 %vm671_vm1, %v2907_v23 }
 0x8ad   : > { %v2626_v24 = vpop.f32.mrf.mxu1 }
 0x8ae   : > { %v2637_v27 = vadd.f32 %v2626_v24, %v3476_v36  ;;  %v2643_v36 = vld [vmem:[%s3688_s12] sm:$0xff] }
 0x8af   : > { %v2628_v25 = vpop.f32.mrf.mxu1 }
 0x8b0   : > { %v2638_v28 = vadd.f32 %v2628_v25, %v3478_v39 }
 0x8b1   : > { %v2632_v29 = vpop.f32.mrf.mxu1 }
 0x8b2   : > { %v2645_v30 = vadd.f32 %v2638_v28, %v2637_v27  ;;  %v2639_v0 = vadd.f32 %v2632_v29, %v3480_v41 }
 0x8b3   : > { %v2634_v31 = vpop.f32.mrf.mxu1 }
 0x8b4   : > { %v2640_v32 = vadd.f32 %v2634_v31, %v836_v42  ;;  %2646 = vadd.xlane.f32.xlu0 %v2645_v30 }
 0x8b6   : > { %v2648_v34 = vadd.f32 %v2640_v32, %v2639_v0 }
 0x8b8   : > { %2649 = vadd.xlane.f32.xlu1 %v2648_v34 }
 0x8c9   : > { %2703 = vperm.xlu1 %2973, %v2641_v56  }
 0x8cd   : > { %2717 = vperm.xlu1 %2973, %v2643_v36  }
 0x8d1   : > { %2722 = vperm.xlu1 %2973, %v2644_v33  }
 0x93d   : > { %v2647_v39 = vpop.xlane.xlu0 %2646 }
 0x93e   : > { %v2651_v41 = vrot.slane %v2647_v39, 4 }
 0x940   : > { %v2652_v47 = vadd.f32 %v2651_v41, %v2647_v39 }
 0x941   : > { %v2650_v35 = vpop.xlane.xlu1 %2649 }
 0x942   : > { %v2653_v37 = vrot.slane %v2652_v47, 2  ;;  %v2657_v38 = vrot.slane %v2650_v35, 4 }
 0x944   : > { %v2654_v40 = vadd.f32 %v2653_v37, %v2652_v47  ;;  %v2658_v1 = vadd.f32 %v2657_v38, %v2650_v35 }
 0x945   : > { %v2704_v19 = vpop.permute.xlu1 %2703 }
 0x946   : > { %v2655_v44 = vrot.slane %v2654_v40, 1  ;;  %v2659_v45 = vrot.slane %v2658_v1, 2 }
 0x948   : > { %v2656_v46 = vadd.f32 %v2655_v44, %v2654_v40  ;;  %v2660_v48 = vadd.f32 %v2659_v45, %v2658_v1 }
 0x949   : > { %v2718_v23 = vpop.permute.xlu1 %2717 }
 0x94a   : > { %v2663_v54 = vmul.f32 0.00048828125, %v2656_v46  ;;  %v2661_v49 = vrot.slane %v2660_v48, 1 }
 0x94c   : > { %v2662_v50 = vadd.f32 %v2661_v49, %v2660_v48  ;;  %v2665_v51 = vsub.f32 %v2637_v27, %v2663_v54  ;;  %v2666_v52 = vsub.f32 %v2638_v28, %v2663_v54 }
 0x94d   : > { %v2723_v36 = vpop.permute.xlu1 %2722 }
 0x94e   : > { %v2664_v55 = vmul.f32 0.00048828125, %v2662_v50  ;;  %v2669_v62 = vmul.f32 %v2665_v51, %v2665_v51  ;;  %v2670_v57 = vmul.f32 %v2666_v52, %v2666_v52 }
 0x950   : > { %v2673_v58 = vadd.f32 %v2670_v57, %v2669_v62  ;;  %v2667_v59 = vsub.f32 %v2639_v0, %v2664_v55  ;;  %v2668_v61 = vsub.f32 %v2640_v32, %v2664_v55 }
 0x952   : > { %2674 = vadd.xlane.f32.xlu0 %v2673_v58  ;;  %v2671_v53 = vmul.f32 %v2667_v59, %v2667_v59  ;;  %v2672_v16 = vmul.f32 %v2668_v61, %v2668_v61 }
 0x954   : > { %v2676_v63 = vadd.f32 %v2672_v16, %v2671_v53 }
 0x956   : > { %2677 = vadd.xlane.f32.xlu0 %v2676_v63 }
 0x96c   : > { %2708 = vperm.xlu0 %2974, %v2642_v2  }
 0x9db   : > { %v2675_v3 = vpop.xlane.xlu0 %2674 }
 0x9dc   : > { %v2679_v43 = vrot.slane %v2675_v3, 4 }
 0x9de   : > { %v2680_v4 = vadd.f32 %v2679_v43, %v2675_v3 }
 0x9df   : > { %v2678_v5 = vpop.xlane.xlu0 %2677 }
 0x9e0   : > { %v2681_v6 = vrot.slane %v2680_v4, 2  ;;  %v2685_v7 = vrot.slane %v2678_v5, 4 }
 0x9e2   : > { %v2682_v8 = vadd.f32 %v2681_v6, %v2680_v4  ;;  %v2686_v9 = vadd.f32 %v2685_v7, %v2678_v5 }
 0x9e4   : > { %v2683_v10 = vrot.slane %v2682_v8, 1  ;;  %v2687_v11 = vrot.slane %v2686_v9, 2 }
 0x9e6   : > { %v2684_v12 = vadd.f32 %v2683_v10, %v2682_v8  ;;  %v2688_v13 = vadd.f32 %v2687_v11, %v2686_v9 }
 0x9e7   : > { %v2709_v31 = vpop.permute.xlu0 %2708 }
 0x9e8   : > { %v2691_v14 = vmul.f32 0.00048828125, %v2684_v12  ;;  %v2689_v15 = vrot.slane %v2688_v13, 1 }
 0x9ea   : > { %v2693_v26 = vadd.f32 1e-05, %v2691_v14  ;;  %v2690_v17 = vadd.f32 %v2689_v15, %v2688_v13 }
 0x9ec   : > { %3015 = vrsqrt.f32 %v2693_v26  ;;  %v2692_v18 = vmul.f32 0.00048828125, %v2690_v17 }
 0x9ee   : > { %v2694_v60 = vadd.f32 1e-05, %v2692_v18 }
 0x9f0   : > { %3017 = vrsqrt.f32 %v2694_v60 }
 0x9f9   : > { %v3016_v20 = vpop.eup %3015 }
 0x9fa   : > { %v2697_v21 = vmul.f32 %v3016_v20, %v2665_v51  ;;  %v2698_v22 = vmul.f32 %v3016_v20, %v2666_v52 }
 0x9fc   : > { %v2711_v24 = vmul.f32 %v2704_v19, %v2697_v21  ;;  %v2712_v25 = vmul.f32 %v2704_v19, %v2698_v22 }
 0x9fd   : > { %v3018_v27 = vpop.eup %3017 }
 0x9fe   : > { %v2699_v28 = vmul.f32 %v3018_v27, %v2667_v59  ;;  %v2700_v29 = vmul.f32 %v3018_v27, %v2668_v61  ;;  %v2725_v42 = vadd.f32 %v2718_v23, %v2711_v24  ;;  %v2726_v30 = vadd.f32 %v2718_v23, %v2712_v25 }
 0xa00   : > { %v2713_v0 = vmul.f32 %v2709_v31, %v2699_v28  ;;  %v2714_v32 = vmul.f32 %v2709_v31, %v2700_v29  ;;  %v2910_v34 = vmul.f32 -1.442695, %v2725_v42  ;;  %v2911_v56 = vmul.f32 -1.442695, %v2726_v30 }
 0xa02   : > { %v2727_v33 = vadd.f32 %v2723_v36, %v2713_v0  ;;  %v2728_v39 = vadd.f32 %v2723_v36, %v2714_v32  ;;  %3019 = vpow2.f32 %v2910_v34 }
 0xa03   : > { %3021 = vpow2.f32 %v2911_v56 }
 0xa04   : > { %v2912_v41 = vmul.f32 -1.442695, %v2727_v33  ;;  %v2913_v47 = vmul.f32 -1.442695, %v2728_v39 }
 0xa06   : > { %3023 = vpow2.f32 %v2912_v41 }
 0xa07   : > { %3025 = vpow2.f32 %v2913_v47 }
 0xa0f   : > { %v3020_v35 = vpop.eup %3019 }
 0xa10   : > { %v3022_v37 = vpop.eup %3021  ;;  %v2741_v38 = vadd.f32 1.0, %v3020_v35 }
 0xa11   : > { %v2742_v40 = vadd.f32 1.0, %v3022_v37 }
 0xa12   : > { %3027 = vrcp.f32 %v2741_v38 }
 0xa13   : > { %v3024_v1 = vpop.eup %3023  ;;  %3029 = vrcp.f32 %v2742_v40 }
 0xa14   : > { %v3026_v44 = vpop.eup %3025  ;;  %v2743_v45 = vadd.f32 1.0, %v3024_v1 }
 0xa15   : > { %v2744_v46 = vadd.f32 1.0, %v3026_v44 }
 0xa16   : > { %3031 = vrcp.f32 %v2743_v45 }
 0xa17   : > { %3033 = vrcp.f32 %v2744_v46 }
 0xa1f   : > { %v3028_v48 = vpop.eup %3027 }
 0xa20   : > { %v3030_v54 = vpop.eup %3029  ;;  %v2753_v49 = vmul.f32 %v3028_v48, %v2725_v42 }
 0xa21   : > { %v2754_v50 = vmul.f32 %v3030_v54, %v2726_v30 }
 0xa22   : > { %2757 = vst [vmem:[%s433_s20] sm:$0xff] %v2753_v49 }
 0xa23   : > { %v3032_v51 = vpop.eup %3031  ;;  %2758 = vst [vmem:[%s433_s20 + $0x8] sm:$0xff] %v2754_v50 }
 0xa24   : > { %v3034_v52 = vpop.eup %3033  ;;  %v2755_v55 = vmul.f32 %v3032_v51, %v2727_v33 }
 0xa25   : > { %v2756_v62 = vmul.f32 %v3034_v52, %v2728_v39 }
 0xa26   : > { %2759 = vst [vmem:[%s433_s20 + $0x10] sm:$0xff] %v2755_v55 }
 0xa27   : > { %2760 = vst [vmem:[%s433_s20 + $0x18] sm:$0xff] %v2756_v62 }
 0xa28   : > { %3048 = shalt.err (!%p3045_p3)
}
 0xa29   : > { %s3049_s15 = scalar_lea.hbm %s3633_s21, 512  ;;  %s3053_s0 = scalar_lea.hbm %s3689_s13, 1024 }
 0xa2a   : > { %p3050_p4 = scmp.ne.s32.totalorder %s3633_s21, %s3049_s15  ;;  %p3054_p9 = scmp.lt.s32.totalorder %s3633_s21, %s3689_s13 }
 0xa2b   : > { %p3055_p10 = scmp.lt.s32.totalorder %s3053_s0, %s3049_s15 }
 0xa2c   : > { %p3051_p7 = pnand %p3050_p4, %p3217_p5 }
 0xa2d   : > { %p3056_p11 = por %p3055_p10, %p3054_p9 }
 0xa2e   : > { %p3052_p8 = pneg %p3051_p7 }
 0xa30   : > { %p3057_p12 = pnand %p3056_p11, %p3052_p8 }
 0xa32   : > { %3060 = shalt.err (!%p3057_p12)
}
 0xa33   : > { %s3108_s1 = smov 256   ;;  %s3736_s2 = smov 16  }
 0xa34   : > { %2923 = dma.vmem_to_hbm [thread:$0]  (%p3217_p5), %s3628_s23, 512, %s3633_s21, %s3635_s16, %s3108_s1, %s3108_s1, %s3736_s2  }
 0xa35 PF: > { %p2929_p13 = scmp.ge.s32.totalorder %s3095_s28, 2  ;;  %s2790_s29 = sand.u32 1, %s3083_s25  }
 0xa36   : > { %s2791_s15 = scalar_lea.sflag [#allocation3], %s2790_s29 }
 0xa37   : > { %p2926_p0 = pnand %p2929_p13, %p3221_p6 }
 0xa39   : > { %p2927_p1 = pneg %p2926_p0 }
 0xa3b   : > { %3078 = dma.done.wait (%p2927_p1), %s2791_s15, 512  }
 0xa3c   : > { %3080 = vsyncadd (%p2927_p1), %s2791_s15, 4294966784  ;;  %p23_p2 = scmp.ge.s32.totalorder %s3204_s14, 4   ;;  %s3737_s25 = smov %s3087_s26 }
 0xa3d   : > { %s3738_s26 = smov %s3091_s27  ;;  %s3739_s27 = smov %s3215_s17 }
 0xa3e   : > { %s3740_s28 = smov %s3204_s14  ;;  %25 = sbr.rel (!%p23_p2) target bundleno = 7 (0x7), region = 109 }
 0xa43   :  { %2796 = vsyncpa [#allocation3], 1 }
 0xa44   :  { %2798 = vsyncpa [#allocation3 + $0x1], 1 }

</bundles_post_ra>
